<compile_context>
chip_gen: v7x
topology: tpu7x:2x2x1
jax: 0.10.0
libtpu: 0.0.40
codegen_flags: <defaults>
</compile_context>

<pallas_src>
import functools

import jax
import jax.numpy as jnp
from jax.experimental import pallas as pl
from jax.experimental.pallas import tpu as pltpu


# ----------------------------------------------------------------------------
# Kernel 1: feature projection  XW = X @ W   (row-tiled, bf16 in, f32 acc)
# ----------------------------------------------------------------------------
def _project_kernel(x_ref, w_ref, o_ref):
    o_ref[...] = jnp.dot(
        x_ref[...], w_ref[...], preferred_element_type=jnp.float32
    ).astype(o_ref.dtype)


def _project(x, w, *, tm):
    """x: [Np, F] bf16, w: [F, H] bf16 -> [Np, H] bf16."""
    n, f = x.shape
    h = w.shape[1]
    assert n % tm == 0 and f % 128 == 0 and h % 128 == 0
    return pl.pallas_call(
        _project_kernel,
        out_shape=jax.ShapeDtypeStruct((n, h), jnp.bfloat16),
        grid_spec=pltpu.PrefetchScalarGridSpec(
            num_scalar_prefetch=0,
            grid=(n // tm,),
            in_specs=[
                pl.BlockSpec((tm, f), lambda i: (i, 0)),  # X row tile
                pl.BlockSpec((f, h), lambda i: (0, 0)),   # W (fetched once)
            ],
            out_specs=pl.BlockSpec((tm, h), lambda i: (i, 0)),
        ),
        compiler_params=pltpu.CompilerParams(
            dimension_semantics=("parallel",)),
    )(x, w)


# ----------------------------------------------------------------------------
# Kernel 2: aggregation + epilogue   out = epilogue(A @ XW + b)
# ----------------------------------------------------------------------------
def _aggregate_kernel(a_ref, xw_ref, b_ref, o_ref, acc_ref, *, epilogue, tk):
    k = pl.program_id(1)

    @pl.when(k == 0)
    def _():
        acc_ref[...] = jnp.zeros_like(acc_ref)

    # A row/col tile is streamed (double-buffered); XW is VMEM-resident and
    # sliced in place -> one HBM read of XW per layer, not per row tile.
    start = pl.multiple_of(k * tk, tk)
    acc_ref[...] += jnp.dot(
        a_ref[...], xw_ref[pl.ds(start, tk), :],
        preferred_element_type=jnp.float32)

    # Epilogue only on the final reduction step (bias/ReLU/exp must NOT be
    # applied to partial sums).
    @pl.when(k == pl.num_programs(1) - 1)
    def _():
        z = acc_ref[...] + b_ref[...]
        if epilogue == "relu":
            z = jnp.maximum(z, 0.0)
        else:  # "exp": clamp / exp / +1
            z = jnp.exp(jnp.clip(z, -20.0, 20.0)) + 1.0
        o_ref[...] = z.astype(o_ref.dtype)


def _aggregate(a, xw, b, *, epilogue, out_dtype, tm, tk):
    """a: [Np,Np] bf16, xw: [Np,H] bf16, b: [1,H] f32 -> [Np,H]."""
    n = a.shape[0]
    h = xw.shape[1]
    assert n % tm == 0 and n % tk == 0 and h % 128 == 0

    out_itemsize = jnp.dtype(out_dtype).itemsize
    vmem_bytes = (
        2 * tm * tk * a.dtype.itemsize       # A tile, double-buffered
        + 2 * n * h * xw.dtype.itemsize      # resident XW (constant index map)
        + 2 * h * 4                          # bias
        + 2 * tm * h * out_itemsize          # output tile
        + tm * h * 4                         # f32 accumulator scratch
    )
    # 48 MiB cap: safe headroom on v7x (64 MiB physical), generous on v5e/v6e.
    vmem_bytes = min(int(vmem_bytes * 1.5) + (8 << 20), 48 << 20)

    kernel = functools.partial(_aggregate_kernel, epilogue=epilogue, tk=tk)
    return pl.pallas_call(
        kernel,
        out_shape=jax.ShapeDtypeStruct((n, h), out_dtype),
        grid_spec=pltpu.PrefetchScalarGridSpec(
            num_scalar_prefetch=0,
            grid=(n // tm, n // tk),
            in_specs=[
                pl.BlockSpec((tm, tk), lambda i, k: (i, k)),  # A tile streamed
                pl.BlockSpec((n, h), lambda i, k: (0, 0)),    # XW resident
                pl.BlockSpec((1, h), lambda i, k: (0, 0)),    # bias resident
                # TODO(synk): pipeline_mode=pl.Buffered(1) on the two
                # constant-index specs would halve their VMEM footprint; only
                # matters if hidden grows well beyond 128.
            ],
            out_specs=pl.BlockSpec((tm, h), lambda i, k: (i, 0)),
            scratch_shapes=[pltpu.VMEM((tm, h), jnp.float32)],
        ),
        compiler_params=pltpu.CompilerParams(
            dimension_semantics=("parallel", "arbitrary"),
            vmem_limit_bytes=vmem_bytes,
        ),
    )(a, xw, b)


# ----------------------------------------------------------------------------
# Full forward: two (project -> aggregate) layer pairs
# ----------------------------------------------------------------------------
def _round_up(v, m):
    return ((v + m - 1) // m) * m


def prepare_adjacency(a_hat, *, block_n=512):
    """Pad + cast the normalized adjacency ONCE (hoisted out of the forward so
    repeated calls on a fixed graph don't re-stream N^2 f32 values)."""
    n = a_hat.shape[0]
    n_pad = _round_up(n, block_n)
    return jnp.zeros((n_pad, n_pad), jnp.bfloat16).at[:n, :n].set(
        a_hat.astype(jnp.bfloat16))
    # TODO(synk): int8-quantized A on v5e/v6e (fp8 on v7x) would halve the
    # dominant N^2 HBM stream; kept bf16 here for a single code path.


def gcn_net_exp(a_padded, x, w1, b1, w2, b2, *, block_n=512):
    """a_padded: [Np,Np] bf16 (from prepare_adjacency), x: [N,in_dim],
    w1: [in_dim,hidden], b1: [1,hidden], w2: [hidden,out_dim], b2: [1,out_dim]
    -> [N,out_dim] f32."""
    n_pad = a_padded.shape[0]
    n, in_dim = x.shape
    hidden = w1.shape[1]
    out_dim = w2.shape[1]
    assert a_padded.shape == (n_pad, n_pad)
    assert n_pad % block_n == 0 and n_pad >= n

    f_pad = _round_up(in_dim, 128)
    h_pad = _round_up(hidden, 128)
    o_pad = _round_up(out_dim, 128)

    # Small per-call padding/casting (features + params only; A is pre-padded).
    x_p = jnp.zeros((n_pad, f_pad), jnp.bfloat16).at[:n, :in_dim].set(
        x.astype(jnp.bfloat16))
    w1_p = jnp.zeros((f_pad, h_pad), jnp.bfloat16).at[:in_dim, :hidden].set(
        w1.astype(jnp.bfloat16))
    b1_p = jnp.zeros((1, h_pad), jnp.float32).at[:, :hidden].set(b1)
    w2_p = jnp.zeros((h_pad, o_pad), jnp.bfloat16).at[:hidden, :out_dim].set(
        w2.astype(jnp.bfloat16))
    b2_p = jnp.zeros((1, o_pad), jnp.float32).at[:, :out_dim].set(b2)

    # Layer 1: h = relu(A @ (X @ W1) + b1); dropout(p=0)/eval is identity.
    xw1 = _project(x_p, w1_p, tm=block_n)
    h = _aggregate(a_padded, xw1, b1_p, epilogue="relu",
                   out_dtype=jnp.bfloat16, tm=block_n, tk=block_n)
    # Layer 2: out = exp(clip(A @ (h @ W2) + b2, -20, 20)) + 1 in f32.
    hw2 = _project(h, w2_p, tm=block_n)
    out = _aggregate(a_padded, hw2, b2_p, epilogue="exp",
                     out_dtype=jnp.float32, tm=block_n, tk=block_n)
    return out[:n, :out_dim]


# ----------------------------------------------------------------------------
# Plain-JAX glue: dense GCN-normalized adjacency, parameter init, reference
# ----------------------------------------------------------------------------
def build_normalized_adjacency(edge_index, edge_weight, num_nodes):
    """Dense GCN normalization with self loops (matches PyG gcn_norm,
    add_self_loops=True, fill_value=1.0)."""
    src = edge_index[0]
    dst = edge_index[1]
    loop_idx = jnp.arange(num_nodes, dtype=edge_index.dtype)
    src = jnp.concatenate([src, loop_idx])
    dst = jnp.concatenate([dst, loop_idx])
    w = jnp.concatenate([edge_weight, jnp.ones((num_nodes,), edge_weight.dtype)])

    # A[dst, src] += w  (node i aggregates messages from sources j of edges j->i)
    a = jnp.zeros((num_nodes, num_nodes), jnp.float32).at[dst, src].add(w)
    deg = a.sum(axis=1)
    deg_inv_sqrt = jnp.where(deg > 0, 1.0 / jnp.sqrt(deg), 0.0)
    return deg_inv_sqrt[:, None] * a * deg_inv_sqrt[None, :]
    # TODO(synk): for very large sparse graphs a gather/scatter aggregation
    # kernel would avoid the dense O(N^2) adjacency entirely.


def glorot(key, out_c, in_c):
    # PyG GCNConv glorot init for lin.weight [out_c, in_c]; stored transposed
    # [in_c, out_c] so the kernel does x @ W.
    limit = jnp.sqrt(6.0 / (in_c + out_c))
    return jax.random.uniform(key, (in_c, out_c), jnp.float32, -limit, limit)


def _reference(a_hat, x, w1, b1, w2, b2):
    """Pure-JAX reference mimicking the kernel's bf16-input / f32-accum math."""
    bf = lambda t: t.astype(jnp.bfloat16).astype(jnp.float32)
    a = bf(a_hat)
    xw1 = bf(bf(x) @ bf(w1))                     # projection stored as bf16
    h = jnp.maximum(a @ xw1 + b1, 0.0)
    hw2 = bf(bf(h) @ bf(w2))                     # layer-1 act + projection bf16
    z = a @ hw2 + b2
    return jnp.exp(jnp.clip(z, -20.0, 20.0)) + 1.0


if __name__ == "__main__":
    # Small demo: N is NOT a tile multiple so padding is exercised, and
    # block_n=256 (256-aligned for the 2x256^2 MXU) gives a (3, 3) grid so the
    # reduction accumulator + epilogue gating run across multiple tiles.
    N = 520
    IN_DIM = 16
    HIDDEN = 32
    OUT_DIM = 8
    E = 2000
    BLOCK_N = 256   # production default is 512 (gcn_net_exp's block_n default)

    key = jax.random.PRNGKey(0)
    k_x, k_src, k_dst, k_w, k_w1, k_w2, k_b1, k_b2 = jax.random.split(key, 8)

    x = jax.random.normal(k_x, (N, IN_DIM), jnp.float32)
    edge_index = jnp.stack(
        [
            jax.random.randint(k_src, (E,), 0, N),
            jax.random.randint(k_dst, (E,), 0, N),
        ],
        axis=0,
    ).astype(jnp.int32)
    edge_weight = jax.random.uniform(k_w, (E,), jnp.float32, 0.1, 1.0)

    w1 = glorot(k_w1, HIDDEN, IN_DIM)           # [IN_DIM, HIDDEN]
    b1 = 0.01 * jax.random.normal(k_b1, (1, HIDDEN), jnp.float32)
    w2 = glorot(k_w2, OUT_DIM, HIDDEN)          # [HIDDEN, OUT_DIM]
    b2 = 0.01 * jax.random.normal(k_b2, (1, OUT_DIM), jnp.float32)

    a_hat = build_normalized_adjacency(edge_index, edge_weight, N)
    a_pad = jax.block_until_ready(prepare_adjacency(a_hat, block_n=BLOCK_N))

    fwd = jax.jit(functools.partial(gcn_net_exp, block_n=BLOCK_N))
    out = jax.block_until_ready(fwd(a_pad, x, w1, b1, w2, b2))

    ref = _reference(a_hat, x, w1, b1, w2, b2)
    assert out.shape == (N, OUT_DIM)
    assert jnp.all(jnp.isfinite(out))
    assert jnp.allclose(out, ref, rtol=1e-2, atol=1e-2), (
        float(jnp.max(jnp.abs(out - ref))))

    print("KERNEL_OK")
</pallas_src>

<mosaic_0001>
module attributes {stable_mosaic.version = 11 : i64} {
  func.func @_project_kernel(%arg0: i32, %arg1: memref<256x128xbf16, #tpu.memory_space<vmem>>, %arg2: memref<128x128xbf16, #tpu.memory_space<vmem>>, %arg3: memref<256x128xbf16, #tpu.memory_space<vmem>>) attributes {dimension_semantics = [#tpu.dimension_semantics<parallel>], iteration_bounds = array<i64: 3>, scalar_prefetch = 0 : i64, scratch_operands = 0 : i64, tpu.core_type = #tpu.core_type<tc>, window_params = [{transform_indices = @transform_0, window_bounds = array<i64: 256, 128>}, {pipeline_mode = #tpu.pipeline_mode<synchronous>, transform_indices = @transform_1, window_bounds = array<i64: 128, 128>}, {transform_indices = @transform_2, window_bounds = array<i64: 256, 128>}]} {
    %c0 = arith.constant 0 : index
    %c0_0 = arith.constant 0 : index
    %0 = vector.load %arg1[%c0, %c0_0] : memref<256x128xbf16, #tpu.memory_space<vmem>>, vector<256x128xbf16>
    %c0_1 = arith.constant 0 : index
    %c0_2 = arith.constant 0 : index
    %1 = vector.load %arg2[%c0_1, %c0_2] : memref<128x128xbf16, #tpu.memory_space<vmem>>, vector<128x128xbf16>
    %cst = arith.constant dense<0.000000e+00> : vector<256x128xf32>
    %2 = tpu.matmul %0, %1, %cst {dimension_numbers = #tpu.dot_dimension_numbers<[1], [0], [0], [1], [0, 0, 1, 1], [], []>} : vector<256x128xbf16>, vector<128x128xbf16>, vector<256x128xf32> -> vector<256x128xf32>
    %3 = arith.truncf %2 : vector<256x128xf32> to vector<256x128xbf16>
    %c0_3 = arith.constant 0 : index
    %c0_4 = arith.constant 0 : index
    %4 = vector.load %arg3[%c0_3, %c0_4] : memref<256x128xbf16, #tpu.memory_space<vmem>>, vector<256x128xbf16>
    tpu.vector_store %arg3[%c0_3, %c0_4], %3 {strides = array<i32>} : memref<256x128xbf16, #tpu.memory_space<vmem>>, vector<256x128xbf16>,
    return
  }
  func.func @transform_0(%arg0: i32) -> (i32, i32) {
    %c0_i32 = arith.constant 0 : i32
    %c0_i32_0 = arith.constant 0 : i32
    return %arg0, %c0_i32 : i32, i32
  }
  func.func @transform_1(%arg0: i32) -> (i32, i32) {
    %c0_i32 = arith.constant 0 : i32
    %c0_i32_0 = arith.constant 0 : i32
    %c0_i32_1 = arith.constant 0 : i32
    return %c0_i32, %c0_i32_0 : i32, i32
  }
  func.func @transform_2(%arg0: i32) -> (i32, i32) {
    %c0_i32 = arith.constant 0 : i32
    %c0_i32_0 = arith.constant 0 : i32
    return %arg0, %c0_i32 : i32, i32
  }
}

module attributes {stable_mosaic.version = 11 : i64} {
  func.func @_aggregate_kernel(%arg0: i32, %arg1: i32, %arg2: memref<256x256xbf16, #tpu.memory_space<vmem>>, %arg3: memref<768x128xbf16, #tpu.memory_space<vmem>>, %arg4: memref<1x128xf32, #tpu.memory_space<vmem>>, %arg5: memref<256x128xbf16, #tpu.memory_space<vmem>>, %arg6: memref<256x128xf32, #tpu.memory_space<vmem>>) attributes {dimension_semantics = [#tpu.dimension_semantics<parallel>, #tpu.dimension_semantics<arbitrary>], iteration_bounds = array<i64: 3, 3>, scalar_prefetch = 0 : i64, scratch_operands = 1 : i64, tpu.core_type = #tpu.core_type<tc>, window_params = [{transform_indices = @transform_0, window_bounds = array<i64: 256, 256>}, {pipeline_mode = #tpu.pipeline_mode<synchronous>, transform_indices = @transform_1, window_bounds = array<i64: 768, 128>}, {pipeline_mode = #tpu.pipeline_mode<synchronous>, transform_indices = @transform_2, window_bounds = array<i64: 1, 128>}, {transform_indices = @transform_3, window_bounds = array<i64: 256, 128>}]} {
    %c0_i32 = arith.constant 0 : i32
    %0 = arith.cmpi eq, %arg1, %c0_i32 : i32
    %1 = arith.extui %0 : i1 to i32
    %c0_i32_0 = arith.constant 0 : i32
    %2 = arith.cmpi ne, %1, %c0_i32_0 : i32
    scf.if %2 {
      %cst_8 = arith.constant 0.000000e+00 : f32
      %15 = vector.broadcast %cst_8 : f32 to vector<256x128xf32>
      %c0_9 = arith.constant 0 : index
      %c0_10 = arith.constant 0 : index
      %16 = vector.load %arg6[%c0_9, %c0_10] : memref<256x128xf32, #tpu.memory_space<vmem>>, vector<256x128xf32>
      tpu.vector_store %arg6[%c0_9, %c0_10], %15 {strides = array<i32>} : memref<256x128xf32, #tpu.memory_space<vmem>>, vector<256x128xf32>,
    } else {
    }
    %c256_i32 = arith.constant 256 : i32
    %3 = arith.muli %arg1, %c256_i32 : i32
    %4 = tpu.assume_multiple %3, 256 : i32
    %c0 = arith.constant 0 : index
    %c0_1 = arith.constant 0 : index
    %5 = vector.load %arg6[%c0, %c0_1] : memref<256x128xf32, #tpu.memory_space<vmem>>, vector<256x128xf32>
    %c0_2 = arith.constant 0 : index
    %c0_3 = arith.constant 0 : index
    %6 = vector.load %arg2[%c0_2, %c0_3] : memref<256x256xbf16, #tpu.memory_space<vmem>>, vector<256x256xbf16>
    %7 = arith.index_cast %4 : i32 to index
    %c0_4 = arith.constant 0 : index
    %8 = vector.load %arg3[%7, %c0_4] : memref<768x128xbf16, #tpu.memory_space<vmem>>, vector<256x128xbf16>
    %cst = arith.constant dense<0.000000e+00> : vector<256x128xf32>
    %9 = tpu.matmul %6, %8, %cst {dimension_numbers = #tpu.dot_dimension_numbers<[1], [0], [0], [1], [0, 0, 1, 1], [], []>} : vector<256x256xbf16>, vector<256x128xbf16>, vector<256x128xf32> -> vector<256x128xf32>
    %10 = arith.addf %5, %9 : vector<256x128xf32>
    %c0_5 = arith.constant 0 : index
    %c0_6 = arith.constant 0 : index
    %11 = vector.load %arg6[%c0_5, %c0_6] : memref<256x128xf32, #tpu.memory_space<vmem>>, vector<256x128xf32>
    tpu.vector_store %arg6[%c0_5, %c0_6], %10 {strides = array<i32>} : memref<256x128xf32, #tpu.memory_space<vmem>>, vector<256x128xf32>,
    %c2_i32 = arith.constant 2 : i32
    %12 = arith.cmpi eq, %arg1, %c2_i32 : i32
    %13 = arith.extui %12 : i1 to i32
    %c0_i32_7 = arith.constant 0 : i32
    %14 = arith.cmpi ne, %13, %c0_i32_7 : i32
    scf.if %14 {
      %c0_8 = arith.constant 0 : index
      %c0_9 = arith.constant 0 : index
      %15 = vector.load %arg6[%c0_8, %c0_9] : memref<256x128xf32, #tpu.memory_space<vmem>>, vector<256x128xf32>
      %c0_10 = arith.constant 0 : index
      %c0_11 = arith.constant 0 : index
      %16 = vector.load %arg4[%c0_10, %c0_11] : memref<1x128xf32, #tpu.memory_space<vmem>>, vector<1x128xf32>
      %17 = vector.broadcast %16 : vector<1x128xf32> to vector<256x128xf32>
      %18 = arith.addf %15, %17 : vector<256x128xf32>
      %cst_12 = arith.constant 0.000000e+00 : f32
      %19 = vector.broadcast %cst_12 : f32 to vector<256x128xf32>
      %20 = arith.maximumf %18, %19 : vector<256x128xf32>
      %21 = arith.truncf %20 : vector<256x128xf32> to vector<256x128xbf16>
      %c0_13 = arith.constant 0 : index
      %c0_14 = arith.constant 0 : index
      %22 = vector.load %arg5[%c0_13, %c0_14] : memref<256x128xbf16, #tpu.memory_space<vmem>>, vector<256x128xbf16>
      tpu.vector_store %arg5[%c0_13, %c0_14], %21 {strides = array<i32>} : memref<256x128xbf16, #tpu.memory_space<vmem>>, vector<256x128xbf16>,
    } else {
    }
    return
  }
  func.func @transform_0(%arg0: i32, %arg1: i32) -> (i32, i32) {
    %c0_i32 = arith.constant 0 : i32
    return %arg0, %arg1 : i32, i32
  }
  func.func @transform_1(%arg0: i32, %arg1: i32) -> (i32, i32) {
    %c0_i32 = arith.constant 0 : i32
    %c0_i32_0 = arith.constant 0 : i32
    %c0_i32_1 = arith.constant 0 : i32
    return %c0_i32, %c0_i32_0 : i32, i32
  }
  func.func @transform_2(%arg0: i32, %arg1: i32) -> (i32, i32) {
    %c0_i32 = arith.constant 0 : i32
    %c0_i32_0 = arith.constant 0 : i32
    %c0_i32_1 = arith.constant 0 : i32
    return %c0_i32, %c0_i32_0 : i32, i32
  }
  func.func @transform_3(%arg0: i32, %arg1: i32) -> (i32, i32) {
    %c0_i32 = arith.constant 0 : i32
    %c0_i32_0 = arith.constant 0 : i32
    return %arg0, %c0_i32 : i32, i32
  }
}

module attributes {stable_mosaic.version = 11 : i64} {
  func.func @_aggregate_kernel(%arg0: i32, %arg1: i32, %arg2: memref<256x256xbf16, #tpu.memory_space<vmem>>, %arg3: memref<768x128xbf16, #tpu.memory_space<vmem>>, %arg4: memref<1x128xf32, #tpu.memory_space<vmem>>, %arg5: memref<256x128xf32, #tpu.memory_space<vmem>>, %arg6: memref<256x128xf32, #tpu.memory_space<vmem>>) attributes {dimension_semantics = [#tpu.dimension_semantics<parallel>, #tpu.dimension_semantics<arbitrary>], iteration_bounds = array<i64: 3, 3>, scalar_prefetch = 0 : i64, scratch_operands = 1 : i64, tpu.core_type = #tpu.core_type<tc>, window_params = [{transform_indices = @transform_0, window_bounds = array<i64: 256, 256>}, {pipeline_mode = #tpu.pipeline_mode<synchronous>, transform_indices = @transform_1, window_bounds = array<i64: 768, 128>}, {pipeline_mode = #tpu.pipeline_mode<synchronous>, transform_indices = @transform_2, window_bounds = array<i64: 1, 128>}, {transform_indices = @transform_3, window_bounds = array<i64: 256, 128>}]} {
    %c0_i32 = arith.constant 0 : i32
    %0 = arith.cmpi eq, %arg1, %c0_i32 : i32
    %1 = arith.extui %0 : i1 to i32
    %c0_i32_0 = arith.constant 0 : i32
    %2 = arith.cmpi ne, %1, %c0_i32_0 : i32
    scf.if %2 {
      %cst_8 = arith.constant 0.000000e+00 : f32
      %15 = vector.broadcast %cst_8 : f32 to vector<256x128xf32>
      %c0_9 = arith.constant 0 : index
      %c0_10 = arith.constant 0 : index
      %16 = vector.load %arg6[%c0_9, %c0_10] : memref<256x128xf32, #tpu.memory_space<vmem>>, vector<256x128xf32>
      tpu.vector_store %arg6[%c0_9, %c0_10], %15 {strides = array<i32>} : memref<256x128xf32, #tpu.memory_space<vmem>>, vector<256x128xf32>,
    } else {
    }
    %c256_i32 = arith.constant 256 : i32
    %3 = arith.muli %arg1, %c256_i32 : i32
    %4 = tpu.assume_multiple %3, 256 : i32
    %c0 = arith.constant 0 : index
    %c0_1 = arith.constant 0 : index
    %5 = vector.load %arg6[%c0, %c0_1] : memref<256x128xf32, #tpu.memory_space<vmem>>, vector<256x128xf32>
    %c0_2 = arith.constant 0 : index
    %c0_3 = arith.constant 0 : index
    %6 = vector.load %arg2[%c0_2, %c0_3] : memref<256x256xbf16, #tpu.memory_space<vmem>>, vector<256x256xbf16>
    %7 = arith.index_cast %4 : i32 to index
    %c0_4 = arith.constant 0 : index
    %8 = vector.load %arg3[%7, %c0_4] : memref<768x128xbf16, #tpu.memory_space<vmem>>, vector<256x128xbf16>
    %cst = arith.constant dense<0.000000e+00> : vector<256x128xf32>
    %9 = tpu.matmul %6, %8, %cst {dimension_numbers = #tpu.dot_dimension_numbers<[1], [0], [0], [1], [0, 0, 1, 1], [], []>} : vector<256x256xbf16>, vector<256x128xbf16>, vector<256x128xf32> -> vector<256x128xf32>
    %10 = arith.addf %5, %9 : vector<256x128xf32>
    %c0_5 = arith.constant 0 : index
    %c0_6 = arith.constant 0 : index
    %11 = vector.load %arg6[%c0_5, %c0_6] : memref<256x128xf32, #tpu.memory_space<vmem>>, vector<256x128xf32>
    tpu.vector_store %arg6[%c0_5, %c0_6], %10 {strides = array<i32>} : memref<256x128xf32, #tpu.memory_space<vmem>>, vector<256x128xf32>,
    %c2_i32 = arith.constant 2 : i32
    %12 = arith.cmpi eq, %arg1, %c2_i32 : i32
    %13 = arith.extui %12 : i1 to i32
    %c0_i32_7 = arith.constant 0 : i32
    %14 = arith.cmpi ne, %13, %c0_i32_7 : i32
    scf.if %14 {
      %c0_8 = arith.constant 0 : index
      %c0_9 = arith.constant 0 : index
      %15 = vector.load %arg6[%c0_8, %c0_9] : memref<256x128xf32, #tpu.memory_space<vmem>>, vector<256x128xf32>
      %c0_10 = arith.constant 0 : index
      %c0_11 = arith.constant 0 : index
      %16 = vector.load %arg4[%c0_10, %c0_11] : memref<1x128xf32, #tpu.memory_space<vmem>>, vector<1x128xf32>
      %17 = vector.broadcast %16 : vector<1x128xf32> to vector<256x128xf32>
      %18 = arith.addf %15, %17 : vector<256x128xf32>
      %cst_12 = arith.constant -2.000000e+01 : f32
      %cst_13 = arith.constant 2.000000e+01 : f32
      %19 = vector.broadcast %cst_12 : f32 to vector<256x128xf32>
      %20 = arith.maximumf %19, %18 : vector<256x128xf32>
      %21 = vector.broadcast %cst_13 : f32 to vector<256x128xf32>
      %22 = arith.minimumf %21, %20 : vector<256x128xf32>
      %23 = math.exp %22 : vector<256x128xf32>
      %cst_14 = arith.constant 1.000000e+00 : f32
      %24 = vector.broadcast %cst_14 : f32 to vector<256x128xf32>
      %25 = arith.addf %23, %24 : vector<256x128xf32>
      %c0_15 = arith.constant 0 : index
      %c0_16 = arith.constant 0 : index
      %26 = vector.load %arg5[%c0_15, %c0_16] : memref<256x128xf32, #tpu.memory_space<vmem>>, vector<256x128xf32>
      tpu.vector_store %arg5[%c0_15, %c0_16], %25 {strides = array<i32>} : memref<256x128xf32, #tpu.memory_space<vmem>>, vector<256x128xf32>,
    } else {
    }
    return
  }
  func.func @transform_0(%arg0: i32, %arg1: i32) -> (i32, i32) {
    %c0_i32 = arith.constant 0 : i32
    return %arg0, %arg1 : i32, i32
  }
  func.func @transform_1(%arg0: i32, %arg1: i32) -> (i32, i32) {
    %c0_i32 = arith.constant 0 : i32
    %c0_i32_0 = arith.constant 0 : i32
    %c0_i32_1 = arith.constant 0 : i32
    return %c0_i32, %c0_i32_0 : i32, i32
  }
  func.func @transform_2(%arg0: i32, %arg1: i32) -> (i32, i32) {
    %c0_i32 = arith.constant 0 : i32
    %c0_i32_0 = arith.constant 0 : i32
    %c0_i32_1 = arith.constant 0 : i32
    return %c0_i32, %c0_i32_0 : i32, i32
  }
  func.func @transform_3(%arg0: i32, %arg1: i32) -> (i32, i32) {
    %c0_i32 = arith.constant 0 : i32
    %c0_i32_0 = arith.constant 0 : i32
    return %arg0, %c0_i32 : i32, i32
  }
}

</mosaic_0001>

<bundles_post_ra>
// kernel: gcn_net_exp.4
= control target key start
LH: loop header
LB: loop body
LE: loop exit
PB: predicated region body
PF: predicated region fallthrough
CT: control target
= control target key end

     0   :  { %s1054_s9 = smov 0   ;;  %s1138_s0 = inlined_call_operand.vmem [shape: bf16[768,128], index: 0, kind: input, shape index: {}]   ;;  %s1139_s1 = inlined_call_operand.vmem [shape: bf16[128,128], index: 1, kind: input, shape index: {}]   ;;  %s1140_s2 = inlined_call_operand.vmem [shape: bf16[768,128], index: 2, kind: output, shape index: {}]  }
   0x1 LB: > { %s717_s10 = sadd.s32 4294967295, %s1037_s9   ;;  %p721_p0 = scmp.ge.s32.totalorder %s1037_s9, 1  ;;  %s1037_s9 = sphi %s1054_s9, %s12_s9  }
   0x2   : > { %p113_p1 = scmp.lt.s32.totalorder %s1037_s9, 4 }
   0x4   : > { %p114_p2 = pnand %p721_p0, %p113_p1 }
   0x5   : > { %v1007_v0 = vld [vmem:[%s1139_s1] sm:$0xff] (!%p114_p2)   ;;  %s722_s13 = sshll.u32 (!%p114_p2), %s717_s10, 5  ;;  %v1008_v1 = vld [vmem:[%s1139_s1 + $0x8] sm:$0xff] (!%p114_p2)   ;;  %v1009_v2 = vld [vmem:[%s1139_s1 + $0x10] sm:$0xff] (!%p114_p2)  }
   0x6   : > { %117 = sbr.rel (%p114_p2) target bundleno = 280 (0x118), region = 28  ;;  %p136_p3 = scmp.lt.s32.totalorder (!%p114_p2), %s722_s13, 95  ;;  %935 = vmatprep.subr.bf16.mxu0 (!%p114_p2), %v1007_v0  ;;  %983 = vmatprep.subr.bf16.mxu1 (!%p114_p2), %v1007_v0  ;;  %v1010_v3 = vld [vmem:[%s1139_s1 + $0x18] sm:$0xff] (!%p114_p2)   ;;  %v1011_v6 = vld [vmem:[%s1139_s1 + $0x20] sm:$0xff] (!%p114_p2)   ;;  %v1012_v7 = vld [vmem:[%s1139_s1 + $0x28] sm:$0xff] (!%p114_p2)  }
   0x7   : > { %936 = vmatpush3.bf16.msra.mxu0 (!%p114_p2), %v1007_v0  ;;  %991 = vmatpush3.bf16.msra.mxu1 (!%p114_p2), %v1007_v0  ;;  %v1013_v8 = vld [vmem:[%s1139_s1 + $0x30] sm:$0xff] (!%p114_p2)   ;;  %v1014_v9 = vld [vmem:[%s1139_s1 + $0x38] sm:$0xff] (!%p114_p2)  }
   0x8   : > { %937 = vmatprep.subr.bf16.mxu0 (!%p114_p2), %v1008_v1  ;;  %984 = vmatprep.subr.bf16.mxu1 (!%p114_p2), %v1008_v1 }
   0xb   : > { %938 = vmatpush3.bf16.msra.mxu0 (!%p114_p2), %v1008_v1  ;;  %992 = vmatpush3.bf16.msra.mxu1 (!%p114_p2), %v1008_v1 }
   0xc   : > { %939 = vmatprep.subr.bf16.mxu0 (!%p114_p2), %v1009_v2  ;;  %985 = vmatprep.subr.bf16.mxu1 (!%p114_p2), %v1009_v2 }
   0xd   : > { %s1142_s13 = smov (!%p136_p3, %s722_s13), 95 }
   0xe   : > { %s723_s18 = sshll.u32 %s1142_s13, 2 }
   0xf   : > { %s1079_s21 = scalar_lea.vmem %s1138_s0, %s723_s18  ;;  %940 = vmatpush3.bf16.msra.mxu0 %v1009_v2  ;;  %993 = vmatpush3.bf16.msra.mxu1 %v1009_v2  ;;  %s1117_s6 = scalar_lea.vmem %s1140_s2, %s723_s18 }
  0x10   : > { %v1015_v4 = vld [vmem:[%s1079_s21] sm:$0xff]   ;;  %941 = vmatprep.subr.bf16.mxu0 %v1010_v3  ;;  %986 = vmatprep.subr.bf16.mxu1 %v1010_v3  ;;  %v1017_v10 = vld [vmem:[%s1079_s21 + $0x8] sm:$0xff]   ;;  %v1019_v12 = vld [vmem:[%s1079_s21 + $0x10] sm:$0xff]  }
  0x11   : > { %v1016_v5 = vld [vmem:[%s1079_s21 + $0x40] sm:$0xff]   ;;  %951 = vmatprep.mubr.bf16.mxu0 %v1015_v4  ;;  %v1018_v11 = vld [vmem:[%s1079_s21 + $0x48] sm:$0xff]   ;;  %v1020_v13 = vld [vmem:[%s1079_s21 + $0x50] sm:$0xff]  }
  0x12   : > { %967 = vmatprep.mubr.bf16.mxu1 %v1016_v5  ;;  %v1021_v14 = vld [vmem:[%s1079_s21 + $0x18] sm:$0xff]   ;;  %v1023_v16 = vld [vmem:[%s1079_s21 + $0x20] sm:$0xff]   ;;  %v1025_v18 = vld [vmem:[%s1079_s21 + $0x28] sm:$0xff]  }
  0x13   : > { %942 = vmatpush3.bf16.msra.mxu0 %v1010_v3  ;;  %994 = vmatpush3.bf16.msra.mxu1 %v1010_v3  ;;  %v1022_v15 = vld [vmem:[%s1079_s21 + $0x58] sm:$0xff]   ;;  %v1024_v17 = vld [vmem:[%s1079_s21 + $0x60] sm:$0xff]   ;;  %v1026_v19 = vld [vmem:[%s1079_s21 + $0x68] sm:$0xff]  }
  0x14   : > { %943 = vmatprep.subr.bf16.mxu0 %v1011_v6  ;;  %987 = vmatprep.subr.bf16.mxu1 %v1011_v6  ;;  %v1027_v20 = vld [vmem:[%s1079_s21 + $0x30] sm:$0xff]   ;;  %v1029_v22 = vld [vmem:[%s1079_s21 + $0x38] sm:$0xff]  }
  0x15   : > { %v1028_v21 = vld [vmem:[%s1079_s21 + $0x70] sm:$0xff]   ;;  %v1030_v23 = vld [vmem:[%s1079_s21 + $0x78] sm:$0xff]  }
  0x17   : > { %944 = vmatpush3.bf16.msra.mxu0 %v1011_v6  ;;  %995 = vmatpush3.bf16.msra.mxu1 %v1011_v6 }
  0x18   : > { %945 = vmatprep.subr.bf16.mxu0 %v1012_v7  ;;  %988 = vmatprep.subr.bf16.mxu1 %v1012_v7 }
  0x1b   : > { %946 = vmatpush3.bf16.msra.mxu0 %v1012_v7  ;;  %996 = vmatpush3.bf16.msra.mxu1 %v1012_v7 }
  0x1c   : > { %947 = vmatprep.subr.bf16.mxu0 %v1013_v8  ;;  %989 = vmatprep.subr.bf16.mxu1 %v1013_v8 }
  0x1f   : > { %948 = vmatpush3.bf16.msra.mxu0 %v1013_v8  ;;  %997 = vmatpush3.bf16.msra.mxu1 %v1013_v8 }
  0x20   : > { %949 = vmatprep.subr.bf16.mxu0 %v1014_v9  ;;  %990 = vmatprep.subr.bf16.mxu1 %v1014_v9 }
  0x23   : > { %950 = vmatpush3.bf16.msra.mxu0 %v1014_v9  ;;  %998 = vmatpush3.bf16.msra.mxu1 %v1014_v9 }
  0x26   : > { %952 = vmatmul.mubr.bf16.vlgmr.msra.gmra.mrb[0].mxu0 %v1017_v10  ;;  %968 = vmatmul.mubr.bf16.vlgmr.msra.gmra.mrb[0].mxu1 %v1018_v11 }
  0x27   : > { %955 = vmatprep.mubr.bf16.mxu0 %v1019_v12  ;;  %971 = vmatprep.mubr.bf16.mxu1 %v1020_v13 }
  0x2e   : > { %956 = vmatmul.mubr.bf16.gmra.mrb[4].mxu0 %v1021_v14  ;;  %972 = vmatmul.mubr.bf16.gmra.mrb[4].mxu1 %v1022_v15 }
  0x2f   : > { %959 = vmatprep.mubr.bf16.mxu0 %v1023_v16  ;;  %975 = vmatprep.mubr.bf16.mxu1 %v1024_v17 }
  0x36   : > { %960 = vmatmul.mubr.bf16.gmra.mrb[8].mxu0 %v1025_v18  ;;  %976 = vmatmul.mubr.bf16.gmra.mrb[8].mxu1 %v1026_v19 }
  0x37   : > { %963 = vmatprep.mubr.bf16.mxu0 %v1027_v20  ;;  %979 = vmatprep.mubr.bf16.mxu1 %v1028_v21 }
  0x3e   : > { %964 = vmatmul.mubr.bf16.gmra.mrb[12].mxu0 %v1029_v22  ;;  %980 = vmatmul.mubr.bf16.gmra.mrb[12].mxu1 %v1030_v23 }
  0xf9   : > { %v953_v24 = vpop.f32.mrb[0].mxu0  ;;  %v969_v25 = vpop.f32.mrb[0].mxu1 }
  0xfa   : > { %v374_v26 = vpop.f32.mrb[1].mxu0  ;;  %v438_v27 = vpop.f32.mrb[1].mxu1 }
  0xfb   : > { %v954_v28 = vpop.f32.mrb[2].mxu0  ;;  %v970_v29 = vpop.f32.mrb[2].mxu1 }
  0xfc   : > { %v824_v30 = vpack.c.bf16 %v954_v28, %v953_v24  ;;  %v864_v31 = vpack.c.bf16 %v970_v29, %v969_v25  ;;  %v377_v32 = vpop.f32.mrb[3].mxu0  ;;  %v441_v33 = vpop.f32.mrb[3].mxu1 }
  0xfd   : > { %v819_v34 = vpack.c.bf16 %v377_v32, %v374_v26  ;;  %v859_v35 = vpack.c.bf16 %v441_v33, %v438_v27 }
  0xfe   : > { %896 = vst [vmem:[%s1117_s6 + $0x8] sm:$0xff] %v824_v30   ;;  %904 = vst [vmem:[%s1117_s6 + $0x48] sm:$0xff] %v864_v31  }
  0xff   : > { %820 = vst [vmem:[%s1117_s6] sm:$0xff] %v819_v34   ;;  %903 = vst [vmem:[%s1117_s6 + $0x40] sm:$0xff] %v859_v35  }
 0x101   : > { %v957_v36 = vpop.f32.mrb[4].mxu0  ;;  %v973_v37 = vpop.f32.mrb[4].mxu1 }
 0x102   : > { %v390_v38 = vpop.f32.mrb[5].mxu0  ;;  %v454_v39 = vpop.f32.mrb[5].mxu1 }
 0x103   : > { %v958_v40 = vpop.f32.mrb[6].mxu0  ;;  %v974_v41 = vpop.f32.mrb[6].mxu1 }
 0x104   : > { %v834_v42 = vpack.c.bf16 %v958_v40, %v957_v36  ;;  %v874_v43 = vpack.c.bf16 %v974_v41, %v973_v37  ;;  %v393_v44 = vpop.f32.mrb[7].mxu0  ;;  %v457_v45 = vpop.f32.mrb[7].mxu1 }
 0x105   : > { %v829_v46 = vpack.c.bf16 %v393_v44, %v390_v38  ;;  %v869_v47 = vpack.c.bf16 %v457_v45, %v454_v39 }
 0x106   : > { %898 = vst [vmem:[%s1117_s6 + $0x18] sm:$0xff] %v834_v42   ;;  %906 = vst [vmem:[%s1117_s6 + $0x58] sm:$0xff] %v874_v43  }
 0x107   : > { %897 = vst [vmem:[%s1117_s6 + $0x10] sm:$0xff] %v829_v46   ;;  %905 = vst [vmem:[%s1117_s6 + $0x50] sm:$0xff] %v869_v47  }
 0x109   : > { %v961_v48 = vpop.f32.mrb[8].mxu0  ;;  %v977_v49 = vpop.f32.mrb[8].mxu1 }
 0x10a   : > { %v406_v50 = vpop.f32.mrb[9].mxu0  ;;  %v470_v51 = vpop.f32.mrb[9].mxu1 }
 0x10b   : > { %v962_v52 = vpop.f32.mrb[10].mxu0  ;;  %v978_v53 = vpop.f32.mrb[10].mxu1 }
 0x10c   : > { %v844_v54 = vpack.c.bf16 %v962_v52, %v961_v48  ;;  %v884_v55 = vpack.c.bf16 %v978_v53, %v977_v49  ;;  %v409_v56 = vpop.f32.mrb[11].mxu0  ;;  %v473_v57 = vpop.f32.mrb[11].mxu1 }
 0x10d   : > { %v839_v58 = vpack.c.bf16 %v409_v56, %v406_v50  ;;  %v879_v59 = vpack.c.bf16 %v473_v57, %v470_v51 }
 0x10e   : > { %900 = vst [vmem:[%s1117_s6 + $0x28] sm:$0xff] %v844_v54   ;;  %908 = vst [vmem:[%s1117_s6 + $0x68] sm:$0xff] %v884_v55  }
 0x10f   : > { %899 = vst [vmem:[%s1117_s6 + $0x20] sm:$0xff] %v839_v58   ;;  %907 = vst [vmem:[%s1117_s6 + $0x60] sm:$0xff] %v879_v59  }
 0x111   : > { %v965_v60 = vpop.f32.mrb[12].mxu0  ;;  %v981_v61 = vpop.f32.mrb[12].mxu1 }
 0x112   : > { %v422_v62 = vpop.f32.mrb[13].mxu0  ;;  %v486_v63 = vpop.f32.mrb[13].mxu1 }
 0x113   : > { %v966_v0 = vpop.f32.mrb[14].mxu0  ;;  %v982_v1 = vpop.f32.mrb[14].mxu1 }
 0x114   : > { %v854_v2 = vpack.c.bf16 %v966_v0, %v965_v60  ;;  %v894_v3 = vpack.c.bf16 %v982_v1, %v981_v61  ;;  %v425_v4 = vpop.f32.mrb[15].mxu0  ;;  %v489_v5 = vpop.f32.mrb[15].mxu1 }
 0x115   : > { %v849_v6 = vpack.c.bf16 %v425_v4, %v422_v62  ;;  %v889_v7 = vpack.c.bf16 %v489_v5, %v486_v63 }
 0x116   : > { %902 = vst [vmem:[%s1117_s6 + $0x38] sm:$0xff] %v854_v2   ;;  %910 = vst [vmem:[%s1117_s6 + $0x78] sm:$0xff] %v894_v3  }
 0x117   : > { %901 = vst [vmem:[%s1117_s6 + $0x30] sm:$0xff] %v849_v6   ;;  %909 = vst [vmem:[%s1117_s6 + $0x70] sm:$0xff] %v889_v7  }
 0x118 PF: > { %s12_s9 = sadd.s32 1, %s1037_s9  }
 0x119   : > { %p9_p4 = scmp.ge.s32.totalorder %s12_s9, 5  }
 0x11b   :  { %11 = sbr.rel (!%p9_p4) target bundleno = 1 (0x1), region = 58 }

// kernel: gcn_net_exp.5
= control target key start
LH: loop header
LB: loop body
LE: loop exit
PB: predicated region body
PF: predicated region fallthrough
CT: control target
= control target key end

     0   :  { %8 = vsyncpa [#allocation4], 0  ;;  %s2058_s0 = inlined_call_operand.hbm [shape: bf16[768,768], index: 0, kind: input, shape index: {}]   ;;  %s2059_s1 = inlined_call_operand.vmem [shape: bf16[768,128], index: 1, kind: input, shape index: {}]   ;;  %s2060_s2 = inlined_call_operand.vmem [shape: f32[1,128], index: 2, kind: input, shape index: {}]   ;;  %s2061_s3 = inlined_call_operand.vmem [shape: bf16[768,128], index: 3, kind: output, shape index: {}]  }
   0x1   :  { %10 = vsyncpa [#allocation4 + $0x1], 0  ;;  %s1799_s12 = smov 0   ;;  %s1801_s13 = smov 0  }
   0x2   :  { %s1803_s14 = smov 0   ;;  %s1805_s15 = smov 0  }
   0x3   :  { %s1807_s16 = smov 0   ;;  %s1809_s17 = smov 0  }
   0x4   :  { %s1811_s18 = smov 0   ;;  %s1813_s19 = smov 0  }
   0x5 LB: > { %s1181_s20 = sadd.s32 4294967295, %s1772_s19   ;;  %s25_s21 = sadd.s32 1, %s1764_s17  ;;  %s1772_s19 = sphi %s1813_s19, %s16_s19   ;;  %s1768_s18 = sphi %s1811_s18, %s2071_s18   ;;  %s1764_s17 = sphi %s1809_s17, %s2070_s17   ;;  %s1760_s16 = sphi %s1807_s16, %s2069_s16   ;;  %s1756_s15 = sphi %s1805_s15, %s2068_s15   ;;  %s1752_s14 = sphi %s1803_s14, %s2067_s14   ;;  %s1748_s13 = sphi %s1801_s13, %s2066_s13   ;;  %s1744_s12 = sphi %s1799_s12, %s2065_s12  }
   0x6   : > { %p26_p0 = scmp.ge.s32.totalorder %s25_s21, 3  ;;  %s28_s22 = sadd.s32 1, %s1768_s18 }
   0x7   : > { %s37_s23 = sadd.s32 1, %s1752_s14  ;;  %p44_p1 = scmp.ne.s32.totalorder %s1752_s14, %s1748_s13 }
   0x8   : > { %s2073_s21 = smov (%p26_p0, %s25_s21), 0  ;;  %s2075_s22 = smov (!%p26_p0, %s28_s22), %s1768_s18 }
   0x9   : > { %s33_s24 = ssub.s32 %s1764_s17, %s2073_s21  ;;  %p45_p2 = scmp.eq.s32.totalorder %s1772_s19, 0 }
   0xa   : > { %p30_p3 = scmp.ge.s32.totalorder %s2075_s22, 3  ;;  %p50_p4 = scmp.ne.s32.totalorder %s1748_s13, %s1744_s12 }
   0xb   : > { %p1850_p5 = por %p45_p2, %p44_p1  ;;  %p51_p6 = scmp.eq.s32.totalorder %s1181_s20, 0 }
   0xc   : > { %s2077_s22 = smov (%p30_p3, %s2075_s22), 0  ;;  %p1543_p8 = scmp.lt.s32.totalorder %s1772_s19, 9 }
   0xd   : > { %p1856_p7 = por %p51_p6, %p50_p4  ;;  %s32_s27 = ssub.s32 %s1768_s18, %s2077_s22 }
   0xe   : > { %s34_s28 = sor.u32 %s33_s24, %s32_s27  ;;  %s148_s29 = sand.u32 1, %s1752_s14  }
   0xf   : > { %p35_p9 = scmp.eq.s32.totalorder %s34_s28, 0  ;;  %s1185_s30 = sshll.u32 %s148_s29, 8 }
  0x10   : > { %s1187_s4 = sshll.u32 %s1764_s17, 1  ;;  %s1536_s6 = smul.u32 192, %s1768_s18 }
  0x11   : > { %s1866_s5 = scalar_select %p35_p9, %s1752_s14, %s37_s23  }
  0x12   : > { %s152_s7 = scalar_lea.vmem [#allocation3], %s1185_s30  ;;  %p1871_p10 = pnand %p1543_p8, %p1850_p5 }
  0x13   : > { %s162_s8 = sshll.u32 %s152_s7, 4  ;;  %s159_s10 = sadd.s32 %s1536_s6, %s1187_s4  ;;  %s1875_s8 = int_to_ptr.vmem [resolvable:$true] %s162_s8 }
  0x14   : > { %s1189_s11 = sshll.u32 %s159_s10, 6  ;;  %s1882_s23 = scalar_lea.sflag [#allocation4], %s148_s29 }
  0x15   : > { %s1880_s24 = scalar_lea.hbm %s2058_s0, %s1189_s11  ;;  %p1678_p12 = pneg %p1871_p10 }
  0x16   : > { %s1676_s25 = scalar_lea.hbm %s1880_s24, 4096  ;;  %s1681_s30 = scalar_lea.hbm %s2058_s0, 36864 }
  0x17   : > { %p1677_p11 = scmp.ne.s32.totalorder %s1880_s24, %s1676_s25  ;;  %p1682_p1 = scmp.lt.u32.totalorder %s1880_s24, %s2058_s0 }
  0x18   : > { %p1683_p2 = scmp.lt.u32.totalorder %s1681_s30, %s1676_s25  ;;  %p1685_p4 = scmp.lt.u32.totalorder %s1676_s25, %s1880_s24 }
  0x19   : > { %p1679_p13 = pnand %p1678_p12, %p1677_p11 }
  0x1a   : > { %p1684_p3 = por %p1683_p2, %p1682_p1 }
  0x1b   : > { %p1680_p0 = pneg %p1679_p13 }
  0x1c   : > { %p1686_p5 = por %p1685_p4, %p1684_p3 }
  0x1e   : > { %p1687_p6 = pnand %p1686_p5, %p1680_p0 }
  0x20   : > { %1690 = shalt.err (!%p1687_p6)
}
  0x21   : > { %s1691_s29 = scalar_lea.vmem %s1875_s8, 4096  ;;  %s1774_s7 = smov [#allocation3]  }
  0x22   : > { %p1692_p8 = scmp.ne.s32.totalorder %s1875_s8, %s1691_s29  ;;  %s1696_s10 = sshll.u32 %s1774_s7, 4  ;;  %s1697_s10 = int_to_ptr.vmem [resolvable:$false] %s1696_s10 }
  0x23   : > { %s1698_s11 = scalar_lea.vmem %s1697_s10, 8192  ;;  %p1699_p13 = scmp.lt.s32.totalorder %s1875_s8, %s1697_s10 }
  0x24   : > { %p1694_p9 = pnand %p1692_p8, %p1678_p12  ;;  %p1700_p1 = scmp.lt.s32.totalorder %s1698_s11, %s1691_s29 }
  0x26   : > { %p1695_p11 = pneg %p1694_p9  ;;  %p1701_p2 = por %p1700_p1, %p1699_p13 }
  0x28   : > { %p1702_p3 = pnand %p1701_p2, %p1695_p11 }
  0x2a   : > { %1705 = shalt.err (!%p1702_p3)
}
  0x2b   : > { %s1775_s12 = smov 384   ;;  %s1776_s20 = smov 128  }
  0x2c   : > { %s1777_s25 = smov 8   ;;  %p1190_p12 = scmp.ge.s32.totalorder %s1772_s19, 1 }
  0x2d   : > { %1542 = dma.hbm_to_vmem [thread:$0]  (!%p1871_p10), %s1880_s24, 4096, %s1875_s8, %s1882_s23, %s1775_s12, %s1776_s20, %s1777_s25  }
  0x2e   : > { %p170_p0 = scmp.lt.s32.totalorder %s1772_s19, 10 }
  0x30   : > { %p171_p4 = pnand %p1190_p12, %p170_p0 }
  0x31   : > { %s176_s27 = sand.u32 (!%p171_p4), 1, %s1748_s13  }
  0x32   : > { %174 = sbr.rel (%p171_p4) target bundleno = 404 (0x194), region = 32  ;;  %s1191_s28 = sshll.u32 (!%p171_p4), %s176_s27, 8 }
  0x33   : > { %s177_s30 = scalar_lea.sflag (!%p171_p4), [#allocation4], %s176_s27  ;;  %s1913_s4 = scalar_lea.vmem (!%p171_p4), [#allocation3], %s1191_s28 }
  0x39   : > { %1739 = dma.done.wait (%p1856_p7), %s177_s30, 4096  }
  0x3a   : > { %1741 = vsyncadd (%p1856_p7), %s177_s30, 4294963200  ;;  %s1192_s6 = sshll.u32 %s1760_s16, 5  ;;  %p1194_p10 = scmp.ne.s32.totalorder %s1756_s15, 0 }
  0x3b   : > { %p206_p5 = scmp.lt.s32.totalorder %s1192_s6, 95  ;;  %v1778_v0 = vmov (!%p1194_p10), 0.0  }
  0x3c   : > { %215 = sbr.rel (%p1194_p10) target bundleno = 76 (0x4c), region = 40  ;;  %216 = vst [vmem:[#allocation2] sm:$0xff] (!%p1194_p10), %v1778_v0  ;;  %217 = vst [vmem:[#allocation2 + $0x8] sm:$0xff] (!%p1194_p10), %v1778_v0 }
  0x3d   : > { %s2079_s6 = smov (!%p206_p5, %s1192_s6), 95  ;;  %218 = vst [vmem:[#allocation2 + $0x10] sm:$0xff] (!%p1194_p10), %v1778_v0  ;;  %219 = vst [vmem:[#allocation2 + $0x18] sm:$0xff] (!%p1194_p10), %v1778_v0 }
  0x3e   : > { %s1193_s8 = sshll.u32 %s2079_s6, 2  ;;  %220 = vst [vmem:[#allocation2 + $0x20] sm:$0xff] (!%p1194_p10), %v1778_v0  ;;  %221 = vst [vmem:[#allocation2 + $0x28] sm:$0xff] (!%p1194_p10), %v1778_v0 }
  0x3f   : > { %s1923_s23 = scalar_lea.vmem %s2061_s3, %s1193_s8  ;;  %222 = vst [vmem:[#allocation2 + $0x30] sm:$0xff] (!%p1194_p10), %v1778_v0  ;;  %223 = vst [vmem:[#allocation2 + $0x38] sm:$0xff] (!%p1194_p10), %v1778_v0 }
  0x40   : > { %224 = vst [vmem:[#allocation2 + $0x40] sm:$0xff] (!%p1194_p10), %v1778_v0  ;;  %225 = vst [vmem:[#allocation2 + $0x48] sm:$0xff] (!%p1194_p10), %v1778_v0 }
  0x41   : > { %226 = vst [vmem:[#allocation2 + $0x50] sm:$0xff] (!%p1194_p10), %v1778_v0  ;;  %227 = vst [vmem:[#allocation2 + $0x58] sm:$0xff] (!%p1194_p10), %v1778_v0 }
  0x42   : > { %228 = vst [vmem:[#allocation2 + $0x60] sm:$0xff] (!%p1194_p10), %v1778_v0  ;;  %229 = vst [vmem:[#allocation2 + $0x68] sm:$0xff] (!%p1194_p10), %v1778_v0 }
  0x43   : > { %230 = vst [vmem:[#allocation2 + $0x70] sm:$0xff] %v1778_v0  ;;  %231 = vst [vmem:[#allocation2 + $0x78] sm:$0xff] %v1778_v0 }
  0x44   : > { %232 = vst [vmem:[#allocation2 + $0x80] sm:$0xff] %v1778_v0  ;;  %233 = vst [vmem:[#allocation2 + $0x88] sm:$0xff] %v1778_v0 }
  0x45   : > { %234 = vst [vmem:[#allocation2 + $0x90] sm:$0xff] %v1778_v0  ;;  %235 = vst [vmem:[#allocation2 + $0x98] sm:$0xff] %v1778_v0 }
  0x46   : > { %236 = vst [vmem:[#allocation2 + $0xa0] sm:$0xff] %v1778_v0  ;;  %237 = vst [vmem:[#allocation2 + $0xa8] sm:$0xff] %v1778_v0 }
  0x47   : > { %238 = vst [vmem:[#allocation2 + $0xb0] sm:$0xff] %v1778_v0  ;;  %239 = vst [vmem:[#allocation2 + $0xb8] sm:$0xff] %v1778_v0 }
  0x48   : > { %240 = vst [vmem:[#allocation2 + $0xc0] sm:$0xff] %v1778_v0  ;;  %241 = vst [vmem:[#allocation2 + $0xc8] sm:$0xff] %v1778_v0 }
  0x49   : > { %242 = vst [vmem:[#allocation2 + $0xd0] sm:$0xff] %v1778_v0  ;;  %243 = vst [vmem:[#allocation2 + $0xd8] sm:$0xff] %v1778_v0 }
  0x4a   : > { %244 = vst [vmem:[#allocation2 + $0xe0] sm:$0xff] %v1778_v0  ;;  %245 = vst [vmem:[#allocation2 + $0xe8] sm:$0xff] %v1778_v0 }
  0x4b   : > { %246 = vst [vmem:[#allocation2 + $0xf0] sm:$0xff] %v1778_v0  ;;  %247 = vst [vmem:[#allocation2 + $0xf8] sm:$0xff] %v1778_v0 }
  0x4c PF: > { %s1195_s16 = sshll.u32 %s1756_s15, 8  ;;  %v1630_v1 = vld [vmem:[%s1913_s4 + $0x4] ss:$8 sps:$4 sm:$0xff]   ;;  %v1628_v19 = vld [vmem:[%s1913_s4] ss:$8 sps:$4 sm:$0xff]   ;;  %p1245_p7 = scmp.ne.s32.totalorder %s1756_s15, 2 }
  0x4d   : > { %s313_s26 = sshra.s32 %s1195_s16, 3  ;;  %v1633_v2 = vld [vmem:[%s1913_s4 + $0x84] ss:$8 sps:$4 sm:$0xff]   ;;  %637 = vmatprep.mubr.bf16.mxu0 %v1630_v1  ;;  %v1631_v20 = vld [vmem:[%s1913_s4 + $0x80] ss:$8 sps:$4 sm:$0xff]  }
  0x4e   : > { %s1196_s29 = sshll.u32 %s313_s26, 2  ;;  %701 = vmatprep.mubr.bf16.mxu1 %v1633_v2  ;;  %v1634_v21 = vld [vmem:[%s1913_s4 + $0x14] ss:$8 sps:$4 sm:$0xff]   ;;  %v1638_v23 = vld [vmem:[%s1913_s4 + $0x10] ss:$8 sps:$4 sm:$0xff]   ;;  %v249_v51 = vld [vmem:[#allocation2] sm:$0xff] }
  0x4f   : > { %s1932_s11 = scalar_lea.vmem %s2059_s1, %s1196_s29  ;;  %v1636_v22 = vld [vmem:[%s1913_s4 + $0x94] ss:$8 sps:$4 sm:$0xff]   ;;  %v1639_v24 = vld [vmem:[%s1913_s4 + $0x90] ss:$8 sps:$4 sm:$0xff]   ;;  %v1640_v25 = vld [vmem:[%s1913_s4 + $0x24] ss:$8 sps:$4 sm:$0xff]  }
  0x50   : > { %v1612_v3 = vld [vmem:[%s1932_s11 + $0x40] sm:$0xff]   ;;  %v1614_v5 = vld [vmem:[%s1932_s11 + $0x48] sm:$0xff]   ;;  %v1616_v7 = vld [vmem:[%s1932_s11 + $0x50] sm:$0xff]  }
  0x51   : > { %v1613_v4 = vld [vmem:[%s1932_s11] sm:$0xff]   ;;  %1408 = vmatprep.subr.bf16.mxu0 %v1612_v3  ;;  %1520 = vmatprep.subr.bf16.mxu1 %v1612_v3  ;;  %v1615_v6 = vld [vmem:[%s1932_s11 + $0x8] sm:$0xff]   ;;  %v1617_v8 = vld [vmem:[%s1932_s11 + $0x10] sm:$0xff]  }
  0x52   : > { %1409 = vmatpush3.bf16.msra.mxu0 %v1613_v4  ;;  %1528 = vmatpush3.bf16.msra.mxu1 %v1613_v4  ;;  %v1618_v9 = vld [vmem:[%s1932_s11 + $0x58] sm:$0xff]   ;;  %v1620_v11 = vld [vmem:[%s1932_s11 + $0x60] sm:$0xff]   ;;  %v1622_v13 = vld [vmem:[%s1932_s11 + $0x68] sm:$0xff]  }
  0x53   : > { %1410 = vmatprep.subr.bf16.mxu0 %v1614_v5  ;;  %1521 = vmatprep.subr.bf16.mxu1 %v1614_v5  ;;  %v1619_v10 = vld [vmem:[%s1932_s11 + $0x18] sm:$0xff]   ;;  %v1621_v12 = vld [vmem:[%s1932_s11 + $0x20] sm:$0xff]   ;;  %v1623_v14 = vld [vmem:[%s1932_s11 + $0x28] sm:$0xff]  }
  0x54   : > { %v1624_v15 = vld [vmem:[%s1932_s11 + $0x70] sm:$0xff]   ;;  %v1626_v17 = vld [vmem:[%s1932_s11 + $0x78] sm:$0xff]   ;;  %v1642_v26 = vld [vmem:[%s1913_s4 + $0xa4] ss:$8 sps:$4 sm:$0xff]  }
  0x55   : > { %v1625_v16 = vld [vmem:[%s1932_s11 + $0x30] sm:$0xff]   ;;  %v1627_v18 = vld [vmem:[%s1932_s11 + $0x38] sm:$0xff]   ;;  %v1644_v27 = vld [vmem:[%s1913_s4 + $0x20] ss:$8 sps:$4 sm:$0xff]  }
  0x56   : > { %1411 = vmatpush3.bf16.msra.mxu0 %v1615_v6  ;;  %1529 = vmatpush3.bf16.msra.mxu1 %v1615_v6  ;;  %v1645_v28 = vld [vmem:[%s1913_s4 + $0xa0] ss:$8 sps:$4 sm:$0xff]   ;;  %v1646_v29 = vld [vmem:[%s1913_s4 + $0x34] ss:$8 sps:$4 sm:$0xff]   ;;  %v1650_v31 = vld [vmem:[%s1913_s4 + $0x30] ss:$8 sps:$4 sm:$0xff]  }
  0x57   : > { %1412 = vmatprep.subr.bf16.mxu0 %v1616_v7  ;;  %1522 = vmatprep.subr.bf16.mxu1 %v1616_v7  ;;  %v1648_v30 = vld [vmem:[%s1913_s4 + $0xb4] ss:$8 sps:$4 sm:$0xff]   ;;  %v1651_v32 = vld [vmem:[%s1913_s4 + $0xb0] ss:$8 sps:$4 sm:$0xff]   ;;  %v1652_v33 = vld [vmem:[%s1913_s4 + $0x44] ss:$8 sps:$4 sm:$0xff]  }
  0x58   : > { %v1654_v34 = vld [vmem:[%s1913_s4 + $0xc4] ss:$8 sps:$4 sm:$0xff]   ;;  %v1656_v35 = vld [vmem:[%s1913_s4 + $0x40] ss:$8 sps:$4 sm:$0xff]   ;;  %v1658_v37 = vld [vmem:[%s1913_s4 + $0x54] ss:$8 sps:$4 sm:$0xff]  }
  0x59   : > { %v1657_v36 = vld [vmem:[%s1913_s4 + $0xc0] ss:$8 sps:$4 sm:$0xff]   ;;  %v1660_v38 = vld [vmem:[%s1913_s4 + $0xd4] ss:$8 sps:$4 sm:$0xff]   ;;  %v1662_v39 = vld [vmem:[%s1913_s4 + $0x50] ss:$8 sps:$4 sm:$0xff]  }
  0x5a   : > { %1413 = vmatpush3.bf16.msra.mxu0 %v1617_v8  ;;  %1530 = vmatpush3.bf16.msra.mxu1 %v1617_v8  ;;  %v1663_v40 = vld [vmem:[%s1913_s4 + $0xd0] ss:$8 sps:$4 sm:$0xff]   ;;  %v1664_v41 = vld [vmem:[%s1913_s4 + $0x64] ss:$8 sps:$4 sm:$0xff]   ;;  %v1668_v43 = vld [vmem:[%s1913_s4 + $0x60] ss:$8 sps:$4 sm:$0xff]  }
  0x5b   : > { %1414 = vmatprep.subr.bf16.mxu0 %v1618_v9  ;;  %1523 = vmatprep.subr.bf16.mxu1 %v1618_v9  ;;  %v1666_v42 = vld [vmem:[%s1913_s4 + $0xe4] ss:$8 sps:$4 sm:$0xff]   ;;  %v1669_v44 = vld [vmem:[%s1913_s4 + $0xe0] ss:$8 sps:$4 sm:$0xff]   ;;  %v1670_v45 = vld [vmem:[%s1913_s4 + $0x74] ss:$8 sps:$4 sm:$0xff]  }
  0x5c   : > { %v1672_v46 = vld [vmem:[%s1913_s4 + $0xf4] ss:$8 sps:$4 sm:$0xff]   ;;  %v1674_v47 = vld [vmem:[%s1913_s4 + $0x70] ss:$8 sps:$4 sm:$0xff]   ;;  %v265_v53 = vld [vmem:[#allocation2 + $0x80] sm:$0xff] }
  0x5d   : > { %v1675_v48 = vld [vmem:[%s1913_s4 + $0xf0] ss:$8 sps:$4 sm:$0xff]   ;;  %v250_v59 = vld [vmem:[#allocation2 + $0x8] sm:$0xff] }
  0x5e   : > { %1415 = vmatpush3.bf16.msra.mxu0 %v1619_v10  ;;  %1531 = vmatpush3.bf16.msra.mxu1 %v1619_v10  ;;  %v266_v61 = vld [vmem:[#allocation2 + $0x88] sm:$0xff]  ;;  %v251_v7 = vld [vmem:[#allocation2 + $0x10] sm:$0xff] }
  0x5f   : > { %1416 = vmatprep.subr.bf16.mxu0 %v1620_v11  ;;  %1524 = vmatprep.subr.bf16.mxu1 %v1620_v11  ;;  %v267_v9 = vld [vmem:[#allocation2 + $0x90] sm:$0xff] }
  0x62   : > { %1417 = vmatpush3.bf16.msra.mxu0 %v1621_v12  ;;  %1532 = vmatpush3.bf16.msra.mxu1 %v1621_v12 }
  0x63   : > { %1418 = vmatprep.subr.bf16.mxu0 %v1622_v13  ;;  %1525 = vmatprep.subr.bf16.mxu1 %v1622_v13 }
  0x66   : > { %1419 = vmatpush3.bf16.msra.mxu0 %v1623_v14  ;;  %1533 = vmatpush3.bf16.msra.mxu1 %v1623_v14 }
  0x67   : > { %1420 = vmatprep.subr.bf16.mxu0 %v1624_v15  ;;  %1526 = vmatprep.subr.bf16.mxu1 %v1624_v15  ;;  %v252_v15 = vld [vmem:[#allocation2 + $0x18] sm:$0xff] }
  0x6a   : > { %1421 = vmatpush3.bf16.msra.mxu0 %v1625_v16  ;;  %1534 = vmatpush3.bf16.msra.mxu1 %v1625_v16 }
  0x6b   : > { %1422 = vmatprep.subr.bf16.mxu0 %v1626_v17  ;;  %1527 = vmatprep.subr.bf16.mxu1 %v1626_v17  ;;  %v268_v17 = vld [vmem:[#allocation2 + $0x98] sm:$0xff] }
  0x6e   : > { %1423 = vmatpush3.bf16.msra.mxu0 %v1627_v18  ;;  %1535 = vmatpush3.bf16.msra.mxu1 %v1627_v18 }
  0x71   : > { %638 = vmatmul.mubr.bf16.vlgmr.msra.gmra.mrb[0].mxu0 %v1628_v19  ;;  %702 = vmatmul.mubr.bf16.vlgmr.msra.gmra.mrb[0].mxu1 %v1631_v20 }
  0x72   : > { %645 = vmatprep.mubr.bf16.mxu0 %v1634_v21  ;;  %709 = vmatprep.mubr.bf16.mxu1 %v1636_v22 }
  0x79   : > { %646 = vmatmul.mubr.bf16.gmra.mrb[4].mxu0 %v1638_v23  ;;  %710 = vmatmul.mubr.bf16.gmra.mrb[4].mxu1 %v1639_v24 }
  0x7a   : > { %653 = vmatprep.mubr.bf16.mxu0 %v1640_v25  ;;  %717 = vmatprep.mubr.bf16.mxu1 %v1642_v26 }
  0x81   : > { %654 = vmatmul.mubr.bf16.gmra.mrb[8].mxu0 %v1644_v27  ;;  %718 = vmatmul.mubr.bf16.gmra.mrb[8].mxu1 %v1645_v28  ;;  %v253_v27 = vld [vmem:[#allocation2 + $0x20] sm:$0xff] }
  0x82   : > { %661 = vmatprep.mubr.bf16.mxu0 %v1646_v29  ;;  %725 = vmatprep.mubr.bf16.mxu1 %v1648_v30  ;;  %v269_v29 = vld [vmem:[#allocation2 + $0xa0] sm:$0xff] }
  0x89   : > { %662 = vmatmul.mubr.bf16.gmra.mrb[12].mxu0 %v1650_v31  ;;  %726 = vmatmul.mubr.bf16.gmra.mrb[12].mxu1 %v1651_v32 }
  0x8a   : > { %669 = vmatprep.mubr.bf16.mxu0 %v1652_v33  ;;  %733 = vmatprep.mubr.bf16.mxu1 %v1654_v34 }
  0x91   : > { %670 = vmatmul.mubr.bf16.gmra.mrb[16].mxu0 %v1656_v35  ;;  %734 = vmatmul.mubr.bf16.gmra.mrb[16].mxu1 %v1657_v36  ;;  %v254_v35 = vld [vmem:[#allocation2 + $0x28] sm:$0xff] }
  0x92   : > { %677 = vmatprep.mubr.bf16.mxu0 %v1658_v37  ;;  %741 = vmatprep.mubr.bf16.mxu1 %v1660_v38  ;;  %v270_v37 = vld [vmem:[#allocation2 + $0xa8] sm:$0xff] }
  0x99   : > { %678 = vmatmul.mubr.bf16.gmra.mrb[20].mxu0 %v1662_v39  ;;  %742 = vmatmul.mubr.bf16.gmra.mrb[20].mxu1 %v1663_v40 }
  0x9a   : > { %685 = vmatprep.mubr.bf16.mxu0 %v1664_v41  ;;  %749 = vmatprep.mubr.bf16.mxu1 %v1666_v42 }
  0xa1   : > { %686 = vmatmul.mubr.bf16.gmra.mrb[24].mxu0 %v1668_v43  ;;  %750 = vmatmul.mubr.bf16.gmra.mrb[24].mxu1 %v1669_v44 }
  0xa2   : > { %693 = vmatprep.mubr.bf16.mxu0 %v1670_v45  ;;  %757 = vmatprep.mubr.bf16.mxu1 %v1672_v46 }
  0xa9   : > { %694 = vmatmul.mubr.bf16.gmra.mrb[28].mxu0 %v1674_v47  ;;  %758 = vmatmul.mubr.bf16.gmra.mrb[28].mxu1 %v1675_v48  ;;  %v255_v47 = vld [vmem:[#allocation2 + $0x30] sm:$0xff] }
 0x144   : > { %v1424_v49 = vpop.f32.mrb[0].mxu0  ;;  %v1472_v50 = vpop.f32.mrb[0].mxu1 }
 0x145   : > { %v1425_v52 = vpop.f32.mrb[1].mxu0  ;;  %v1473_v54 = vpop.f32.mrb[1].mxu1 }
 0x146   : > { %v1426_v55 = vadd.f32 %v1425_v52, %v1424_v49  ;;  %v1474_v56 = vadd.f32 %v1473_v54, %v1472_v50  ;;  %v1427_v57 = vpop.f32.mrb[2].mxu0  ;;  %v1475_v58 = vpop.f32.mrb[2].mxu1  ;;  %v271_v49 = vld [vmem:[#allocation2 + $0xb0] sm:$0xff] }
 0x147   : > { %v1428_v60 = vpop.f32.mrb[3].mxu0  ;;  %v1476_v62 = vpop.f32.mrb[3].mxu1 }
 0x148   : > { %v766_v63 = vadd.f32 %v1426_v55, %v249_v51  ;;  %v782_v0 = vadd.f32 %v1474_v56, %v265_v53  ;;  %v1429_v1 = vadd.f32 %v1428_v60, %v1427_v57  ;;  %v1477_v2 = vadd.f32 %v1476_v62, %v1475_v58  ;;  %v256_v55 = vld [vmem:[#allocation2 + $0x38] sm:$0xff] }
 0x149   : > { %v272_v57 = vld [vmem:[#allocation2 + $0xb8] sm:$0xff] }
 0x14a   : > { %798 = vst [vmem:[#allocation2] sm:$0xff] %v766_v63  ;;  %814 = vst [vmem:[#allocation2 + $0x80] sm:$0xff] %v782_v0  ;;  %v767_v3 = vadd.f32 %v1429_v1, %v250_v59  ;;  %v783_v4 = vadd.f32 %v1477_v2, %v266_v61 }
 0x14c   : > { %799 = vst [vmem:[#allocation2 + $0x8] sm:$0xff] %v767_v3  ;;  %815 = vst [vmem:[#allocation2 + $0x88] sm:$0xff] %v783_v4  ;;  %v1430_v5 = vpop.f32.mrb[4].mxu0  ;;  %v1478_v6 = vpop.f32.mrb[4].mxu1  ;;  %v257_v3 = vld [vmem:[#allocation2 + $0x40] sm:$0xff] }
 0x14d   : > { %v1431_v8 = vpop.f32.mrb[5].mxu0  ;;  %v1479_v10 = vpop.f32.mrb[5].mxu1 }
 0x14e   : > { %v1432_v11 = vadd.f32 %v1431_v8, %v1430_v5  ;;  %v1480_v12 = vadd.f32 %v1479_v10, %v1478_v6  ;;  %v1433_v13 = vpop.f32.mrb[6].mxu0  ;;  %v1481_v14 = vpop.f32.mrb[6].mxu1  ;;  %v273_v5 = vld [vmem:[#allocation2 + $0xc0] sm:$0xff] }
 0x14f   : > { %v1434_v16 = vpop.f32.mrb[7].mxu0  ;;  %v1482_v18 = vpop.f32.mrb[7].mxu1 }
 0x150   : > { %v768_v19 = vadd.f32 %v1432_v11, %v251_v7  ;;  %v784_v20 = vadd.f32 %v1480_v12, %v267_v9  ;;  %v1435_v21 = vadd.f32 %v1434_v16, %v1433_v13  ;;  %v1483_v22 = vadd.f32 %v1482_v18, %v1481_v14  ;;  %v258_v11 = vld [vmem:[#allocation2 + $0x48] sm:$0xff] }
 0x151   : > { %v274_v13 = vld [vmem:[#allocation2 + $0xc8] sm:$0xff] }
 0x152   : > { %800 = vst [vmem:[#allocation2 + $0x10] sm:$0xff] %v768_v19  ;;  %816 = vst [vmem:[#allocation2 + $0x90] sm:$0xff] %v784_v20  ;;  %v769_v23 = vadd.f32 %v1435_v21, %v252_v15  ;;  %v785_v24 = vadd.f32 %v1483_v22, %v268_v17 }
 0x154   : > { %801 = vst [vmem:[#allocation2 + $0x18] sm:$0xff] %v769_v23  ;;  %817 = vst [vmem:[#allocation2 + $0x98] sm:$0xff] %v785_v24  ;;  %v1436_v25 = vpop.f32.mrb[8].mxu0  ;;  %v1484_v26 = vpop.f32.mrb[8].mxu1  ;;  %v259_v23 = vld [vmem:[#allocation2 + $0x50] sm:$0xff] }
 0x155   : > { %v1437_v28 = vpop.f32.mrb[9].mxu0  ;;  %v1485_v30 = vpop.f32.mrb[9].mxu1 }
 0x156   : > { %v1438_v31 = vadd.f32 %v1437_v28, %v1436_v25  ;;  %v1486_v32 = vadd.f32 %v1485_v30, %v1484_v26  ;;  %v1439_v33 = vpop.f32.mrb[10].mxu0  ;;  %v1487_v34 = vpop.f32.mrb[10].mxu1  ;;  %v275_v25 = vld [vmem:[#allocation2 + $0xd0] sm:$0xff] }
 0x157   : > { %v1440_v36 = vpop.f32.mrb[11].mxu0  ;;  %v1488_v38 = vpop.f32.mrb[11].mxu1 }
 0x158   : > { %v770_v39 = vadd.f32 %v1438_v31, %v253_v27  ;;  %v786_v40 = vadd.f32 %v1486_v32, %v269_v29  ;;  %v1441_v41 = vadd.f32 %v1440_v36, %v1439_v33  ;;  %v1489_v42 = vadd.f32 %v1488_v38, %v1487_v34  ;;  %v260_v31 = vld [vmem:[#allocation2 + $0x58] sm:$0xff] }
 0x159   : > { %v276_v33 = vld [vmem:[#allocation2 + $0xd8] sm:$0xff] }
 0x15a   : > { %802 = vst [vmem:[#allocation2 + $0x20] sm:$0xff] %v770_v39  ;;  %818 = vst [vmem:[#allocation2 + $0xa0] sm:$0xff] %v786_v40  ;;  %v771_v43 = vadd.f32 %v1441_v41, %v254_v35  ;;  %v787_v44 = vadd.f32 %v1489_v42, %v270_v37 }
 0x15c   : > { %803 = vst [vmem:[#allocation2 + $0x28] sm:$0xff] %v771_v43  ;;  %819 = vst [vmem:[#allocation2 + $0xa8] sm:$0xff] %v787_v44  ;;  %v1442_v45 = vpop.f32.mrb[12].mxu0  ;;  %v1490_v46 = vpop.f32.mrb[12].mxu1  ;;  %v261_v43 = vld [vmem:[#allocation2 + $0x60] sm:$0xff] }
 0x15d   : > { %v1443_v48 = vpop.f32.mrb[13].mxu0  ;;  %v1491_v50 = vpop.f32.mrb[13].mxu1 }
 0x15e   : > { %v1444_v51 = vadd.f32 %v1443_v48, %v1442_v45  ;;  %v1492_v52 = vadd.f32 %v1491_v50, %v1490_v46  ;;  %v1445_v53 = vpop.f32.mrb[14].mxu0  ;;  %v1493_v54 = vpop.f32.mrb[14].mxu1  ;;  %v277_v45 = vld [vmem:[#allocation2 + $0xe0] sm:$0xff] }
 0x15f   : > { %v1446_v56 = vpop.f32.mrb[15].mxu0  ;;  %v1494_v58 = vpop.f32.mrb[15].mxu1 }
 0x160   : > { %v772_v59 = vadd.f32 %v1444_v51, %v255_v47  ;;  %v788_v60 = vadd.f32 %v1492_v52, %v271_v49  ;;  %v1447_v61 = vadd.f32 %v1446_v56, %v1445_v53  ;;  %v1495_v62 = vadd.f32 %v1494_v58, %v1493_v54  ;;  %v262_v51 = vld [vmem:[#allocation2 + $0x68] sm:$0xff] }
 0x161   : > { %v278_v53 = vld [vmem:[#allocation2 + $0xe8] sm:$0xff] }
 0x162   : > { %804 = vst [vmem:[#allocation2 + $0x30] sm:$0xff] %v772_v59  ;;  %820 = vst [vmem:[#allocation2 + $0xb0] sm:$0xff] %v788_v60  ;;  %v773_v63 = vadd.f32 %v1447_v61, %v256_v55  ;;  %v789_v0 = vadd.f32 %v1495_v62, %v272_v57 }
 0x164   : > { %805 = vst [vmem:[#allocation2 + $0x38] sm:$0xff] %v773_v63  ;;  %821 = vst [vmem:[#allocation2 + $0xb8] sm:$0xff] %v789_v0  ;;  %v1448_v1 = vpop.f32.mrb[16].mxu0  ;;  %v1496_v2 = vpop.f32.mrb[16].mxu1  ;;  %v263_v63 = vld [vmem:[#allocation2 + $0x70] sm:$0xff] }
 0x165   : > { %v1449_v4 = vpop.f32.mrb[17].mxu0  ;;  %v1497_v6 = vpop.f32.mrb[17].mxu1 }
 0x166   : > { %v1450_v7 = vadd.f32 %v1449_v4, %v1448_v1  ;;  %v1498_v8 = vadd.f32 %v1497_v6, %v1496_v2  ;;  %v1451_v9 = vpop.f32.mrb[18].mxu0  ;;  %v1499_v10 = vpop.f32.mrb[18].mxu1  ;;  %v279_v1 = vld [vmem:[#allocation2 + $0xf0] sm:$0xff] }
 0x167   : > { %v1452_v12 = vpop.f32.mrb[19].mxu0  ;;  %v1500_v14 = vpop.f32.mrb[19].mxu1 }
 0x168   : > { %v774_v15 = vadd.f32 %v1450_v7, %v257_v3  ;;  %v790_v16 = vadd.f32 %v1498_v8, %v273_v5  ;;  %v1453_v17 = vadd.f32 %v1452_v12, %v1451_v9  ;;  %v1501_v18 = vadd.f32 %v1500_v14, %v1499_v10  ;;  %v264_v7 = vld [vmem:[#allocation2 + $0x78] sm:$0xff] }
 0x169   : > { %v280_v9 = vld [vmem:[#allocation2 + $0xf8] sm:$0xff] }
 0x16a   : > { %806 = vst [vmem:[#allocation2 + $0x40] sm:$0xff] %v774_v15  ;;  %822 = vst [vmem:[#allocation2 + $0xc0] sm:$0xff] %v790_v16  ;;  %v775_v19 = vadd.f32 %v1453_v17, %v258_v11  ;;  %v791_v20 = vadd.f32 %v1501_v18, %v274_v13  ;;  %v834_v17 = vld [vmem:[#allocation2] sm:$0xff] (!%p1245_p7)  ;;  %v835_v18 = vld [vmem:[#allocation2 + $0x8] sm:$0xff] (!%p1245_p7) }
 0x16c   : > { %807 = vst [vmem:[#allocation2 + $0x48] sm:$0xff] %v775_v19  ;;  %823 = vst [vmem:[#allocation2 + $0xc8] sm:$0xff] %v791_v20  ;;  %v1454_v21 = vpop.f32.mrb[20].mxu0  ;;  %v1502_v22 = vpop.f32.mrb[20].mxu1  ;;  %v1984_v19 = vld [vmem:[%s2060_s2] ss:$0 sm:$0xff] (!%p1245_p7) }
 0x16d   : > { %v1455_v24 = vpop.f32.mrb[21].mxu0  ;;  %v1503_v26 = vpop.f32.mrb[21].mxu1  ;;  %v873_v20 = vadd.f32 (!%p1245_p7), %v1984_v19, %v834_v17  ;;  %v856_v17 = vld [vmem:[#allocation2 + $0xb0] sm:$0xff] (!%p1245_p7) }
 0x16e   : > { %v1456_v27 = vadd.f32 %v1455_v24, %v1454_v21  ;;  %v1504_v28 = vadd.f32 %v1503_v26, %v1502_v22  ;;  %v1457_v29 = vpop.f32.mrb[22].mxu0  ;;  %v1505_v30 = vpop.f32.mrb[22].mxu1  ;;  %v874_v21 = vadd.f32 (!%p1245_p7), %v1984_v19, %v835_v18  ;;  %v836_v22 = vld [vmem:[#allocation2 + $0x10] sm:$0xff] (!%p1245_p7)  ;;  %v838_v24 = vld [vmem:[#allocation2 + $0x20] sm:$0xff] (!%p1245_p7)  ;;  %v857_v18 = vld [vmem:[#allocation2 + $0xb8] sm:$0xff] (!%p1245_p7) }
 0x16f   : > { %v1458_v32 = vpop.f32.mrb[23].mxu0  ;;  %v1506_v34 = vpop.f32.mrb[23].mxu1 }
 0x170   : > { %v776_v35 = vadd.f32 %v1456_v27, %v259_v23  ;;  %v792_v36 = vadd.f32 %v1504_v28, %v275_v25  ;;  %v1459_v37 = vadd.f32 %v1458_v32, %v1457_v29  ;;  %v1507_v38 = vadd.f32 %v1506_v34, %v1505_v30  ;;  %v837_v23 = vld [vmem:[#allocation2 + $0x18] sm:$0xff] (!%p1245_p7)  ;;  %v839_v27 = vld [vmem:[#allocation2 + $0x28] sm:$0xff] (!%p1245_p7)  ;;  %v840_v29 = vld [vmem:[#allocation2 + $0x30] sm:$0xff] (!%p1245_p7) }
 0x171   : > { %v875_v25 = vadd.f32 (!%p1245_p7), %v1984_v19, %v836_v22  ;;  %v876_v26 = vadd.f32 (!%p1245_p7), %v1984_v19, %v837_v23  ;;  %v877_v28 = vadd.f32 (!%p1245_p7), %v1984_v19, %v838_v24  ;;  %v841_v30 = vld [vmem:[#allocation2 + $0x38] sm:$0xff] (!%p1245_p7)  ;;  %v906_v32 = vmax.f32 (!%p1245_p7), %v874_v21, 0.0  ;;  %v858_v24 = vld [vmem:[#allocation2 + $0xc0] sm:$0xff] (!%p1245_p7) }
 0x172   : > { %808 = vst [vmem:[#allocation2 + $0x50] sm:$0xff] %v776_v35  ;;  %824 = vst [vmem:[#allocation2 + $0xd0] sm:$0xff] %v792_v36  ;;  %v777_v39 = vadd.f32 %v1459_v37, %v260_v31  ;;  %v793_v40 = vadd.f32 %v1507_v38, %v276_v33  ;;  %v905_v31 = vmax.f32 (!%p1245_p7), %v873_v20, 0.0  ;;  %v878_v33 = vadd.f32 (!%p1245_p7), %v1984_v19, %v839_v27  ;;  %v842_v35 = vld [vmem:[#allocation2 + $0x40] sm:$0xff] (!%p1245_p7) }
 0x173   : > { %v879_v34 = vadd.f32 (!%p1245_p7), %v1984_v19, %v840_v29  ;;  %v843_v36 = vld [vmem:[#allocation2 + $0x48] sm:$0xff] (!%p1245_p7)  ;;  %v907_v38 = vmax.f32 (!%p1245_p7), %v875_v25, 0.0 }
 0x174   : > { %809 = vst [vmem:[#allocation2 + $0x58] sm:$0xff] %v777_v39  ;;  %825 = vst [vmem:[#allocation2 + $0xd8] sm:$0xff] %v793_v40  ;;  %v1460_v41 = vpop.f32.mrb[24].mxu0  ;;  %v1508_v42 = vpop.f32.mrb[24].mxu1  ;;  %v908_v39 = vmax.f32 (!%p1245_p7), %v876_v26, 0.0  ;;  %v909_v40 = vmax.f32 (!%p1245_p7), %v877_v28, 0.0 }
 0x175   : > { %v1461_v44 = vpop.f32.mrb[25].mxu0  ;;  %v1509_v46 = vpop.f32.mrb[25].mxu1  ;;  %v859_v25 = vld [vmem:[#allocation2 + $0xc8] sm:$0xff] (!%p1245_p7) }
 0x176   : > { %v1462_v47 = vadd.f32 %v1461_v44, %v1460_v41  ;;  %v1510_v48 = vadd.f32 %v1509_v46, %v1508_v42  ;;  %v1463_v49 = vpop.f32.mrb[26].mxu0  ;;  %v1511_v50 = vpop.f32.mrb[26].mxu1  ;;  %v880_v41 = vadd.f32 (!%p1245_p7), %v1984_v19, %v841_v30  ;;  %v1316_v44 = vpack.c.bf16 (!%p1245_p7), %v906_v32, %v905_v31 }
 0x177   : > { %v1464_v52 = vpop.f32.mrb[27].mxu0  ;;  %v1512_v54 = vpop.f32.mrb[27].mxu1  ;;  %v911_v46 = vmax.f32 (!%p1245_p7), %v879_v34, 0.0  ;;  %v896_v34 = vadd.f32 (!%p1245_p7), %v1984_v19, %v857_v18 }
 0x178   : > { %v778_v55 = vadd.f32 %v1462_v47, %v261_v43  ;;  %v794_v56 = vadd.f32 %v1510_v48, %v277_v45  ;;  %v1465_v57 = vadd.f32 %v1464_v52, %v1463_v49  ;;  %v1513_v58 = vadd.f32 %v1512_v54, %v1511_v50  ;;  %1317 = vst [vmem:[%s1923_s23] sm:$0xff] (!%p1245_p7), %v1316_v44  }
 0x179   : > { %v844_v37 = vld [vmem:[#allocation2 + $0x50] sm:$0xff] (!%p1245_p7)  ;;  %v910_v45 = vmax.f32 (!%p1245_p7), %v878_v33, 0.0  ;;  %v881_v47 = vadd.f32 (!%p1245_p7), %v1984_v19, %v842_v35  ;;  %v1321_v49 = vpack.c.bf16 (!%p1245_p7), %v908_v39, %v907_v38  ;;  %v912_v50 = vmax.f32 (!%p1245_p7), %v880_v41, 0.0 }
 0x17a   : > { %810 = vst [vmem:[#allocation2 + $0x60] sm:$0xff] %v778_v55  ;;  %826 = vst [vmem:[#allocation2 + $0xe0] sm:$0xff] %v794_v56  ;;  %v779_v59 = vadd.f32 %v1465_v57, %v262_v51  ;;  %v795_v60 = vadd.f32 %v1513_v58, %v278_v53  ;;  %v882_v51 = vadd.f32 (!%p1245_p7), %v1984_v19, %v843_v36  ;;  %v860_v30 = vld [vmem:[#allocation2 + $0xd0] sm:$0xff] (!%p1245_p7)  ;;  %v928_v44 = vmax.f32 (!%p1245_p7), %v896_v34, 0.0 }
 0x17b   : > { %v845_v42 = vld [vmem:[#allocation2 + $0x58] sm:$0xff] (!%p1245_p7)  ;;  %v883_v52 = vadd.f32 (!%p1245_p7), %v1984_v19, %v844_v37  ;;  %v1326_v55 = vpack.c.bf16 (!%p1245_p7), %v910_v45, %v909_v40  ;;  %v913_v56 = vmax.f32 (!%p1245_p7), %v881_v47, 0.0  ;;  %1393 = vst [vmem:[%s1923_s23 + $0x8] sm:$0xff] (!%p1245_p7), %v1321_v49   ;;  %v895_v33 = vadd.f32 (!%p1245_p7), %v1984_v19, %v856_v17 }
 0x17c   : > { %811 = vst [vmem:[#allocation2 + $0x68] sm:$0xff] %v779_v59  ;;  %827 = vst [vmem:[#allocation2 + $0xe8] sm:$0xff] %v795_v60  ;;  %v1466_v61 = vpop.f32.mrb[28].mxu0  ;;  %v1514_v62 = vpop.f32.mrb[28].mxu1  ;;  %v884_v57 = vadd.f32 (!%p1245_p7), %v1984_v19, %v845_v42  ;;  %v850_v59 = vld [vmem:[#allocation2 + $0x80] sm:$0xff] (!%p1245_p7)  ;;  %v851_v60 = vld [vmem:[#allocation2 + $0x88] sm:$0xff] (!%p1245_p7)  ;;  %v897_v38 = vadd.f32 (!%p1245_p7), %v1984_v19, %v858_v24  ;;  %v898_v39 = vadd.f32 (!%p1245_p7), %v1984_v19, %v859_v25 }
 0x17d   : > { %v1467_v0 = vpop.f32.mrb[29].mxu0  ;;  %v1515_v2 = vpop.f32.mrb[29].mxu1  ;;  %1394 = vst [vmem:[%s1923_s23 + $0x10] sm:$0xff] (!%p1245_p7), %v1326_v55   ;;  %v861_v35 = vld [vmem:[#allocation2 + $0xd8] sm:$0xff] (!%p1245_p7)  ;;  %v899_v45 = vadd.f32 (!%p1245_p7), %v1984_v19, %v860_v30 }
 0x17e   : > { %v1468_v3 = vadd.f32 %v1467_v0, %v1466_v61  ;;  %v1516_v4 = vadd.f32 %v1515_v2, %v1514_v62  ;;  %v1469_v5 = vpop.f32.mrb[30].mxu0  ;;  %v1517_v6 = vpop.f32.mrb[30].mxu1  ;;  %833 = sbr.rel (%p1245_p7) target bundleno = 404 (0x194), region = 44  ;;  %v1331_v61 = vpack.c.bf16 (!%p1245_p7), %v912_v50, %v911_v46  ;;  %v914_v62 = vmax.f32 (!%p1245_p7), %v882_v51, 0.0 }
 0x17f   : > { %v1470_v8 = vpop.f32.mrb[31].mxu0  ;;  %v1518_v10 = vpop.f32.mrb[31].mxu1  ;;  %v916_v2 = vmax.f32 (!%p1245_p7), %v884_v57, 0.0  ;;  %v929_v49 = vmax.f32 (!%p1245_p7), %v897_v38, 0.0  ;;  %v930_v50 = vmax.f32 (!%p1245_p7), %v898_v39, 0.0  ;;  %v900_v51 = vadd.f32 (!%p1245_p7), %v1984_v19, %v861_v35 }
 0x180   : > { %v780_v11 = vadd.f32 %v1468_v3, %v263_v63  ;;  %v796_v12 = vadd.f32 %v1516_v4, %v279_v1  ;;  %v1471_v13 = vadd.f32 %v1470_v8, %v1469_v5  ;;  %v1519_v14 = vadd.f32 %v1518_v10, %v1517_v6  ;;  %v852_v1 = vld [vmem:[#allocation2 + $0x90] sm:$0xff] (!%p1245_p7)  ;;  %v853_v6 = vld [vmem:[#allocation2 + $0x98] sm:$0xff] (!%p1245_p7)  ;;  %1395 = vst [vmem:[%s1923_s23 + $0x18] sm:$0xff] (!%p1245_p7), %v1331_v61  }
 0x181   : > { %v846_v43 = vld [vmem:[#allocation2 + $0x60] sm:$0xff] (!%p1245_p7)  ;;  %v915_v63 = vmax.f32 (!%p1245_p7), %v883_v52, 0.0  ;;  %v890_v10 = vadd.f32 (!%p1245_p7), %v1984_v19, %v851_v60  ;;  %v892_v23 = vadd.f32 (!%p1245_p7), %v1984_v19, %v853_v6  ;;  %v932_v57 = vmax.f32 (!%p1245_p7), %v900_v51, 0.0 }
 0x182   : > { %812 = vst [vmem:[#allocation2 + $0x70] sm:$0xff] %v780_v11  ;;  %828 = vst [vmem:[#allocation2 + $0xf0] sm:$0xff] %v796_v12  ;;  %v781_v15 = vadd.f32 %v1471_v13, %v264_v7  ;;  %v797_v16 = vadd.f32 %v1519_v14, %v280_v9  ;;  %v885_v58 = vadd.f32 (!%p1245_p7), %v1984_v19, %v846_v43  ;;  %v854_v11 = vld [vmem:[#allocation2 + $0xa0] sm:$0xff] (!%p1245_p7)  ;;  %v855_v12 = vld [vmem:[#allocation2 + $0xa8] sm:$0xff] (!%p1245_p7)  ;;  %v927_v43 = vmax.f32 (!%p1245_p7), %v895_v33, 0.0 }
 0x183   : > { %v847_v48 = vld [vmem:[#allocation2 + $0x68] sm:$0xff] (!%p1245_p7)  ;;  %v1336_v7 = vpack.c.bf16 (!%p1245_p7), %v914_v62, %v913_v56  ;;  %v889_v9 = vadd.f32 (!%p1245_p7), %v1984_v19, %v850_v59  ;;  %v1341_v13 = vpack.c.bf16 (!%p1245_p7), %v916_v2, %v915_v63  ;;  %v922_v22 = vmax.f32 (!%p1245_p7), %v890_v10, 0.0  ;;  %v862_v40 = vld [vmem:[#allocation2 + $0xe0] sm:$0xff] (!%p1245_p7) }
 0x184   : > { %813 = vst [vmem:[#allocation2 + $0x78] sm:$0xff] %v781_v15  ;;  %829 = vst [vmem:[#allocation2 + $0xf8] sm:$0xff] %v797_v16  ;;  %v886_v0 = vadd.f32 (!%p1245_p7), %v1984_v19, %v847_v48  ;;  %v917_v3 = vmax.f32 (!%p1245_p7), %v885_v58, 0.0  ;;  %v891_v16 = vadd.f32 (!%p1245_p7), %v1984_v19, %v852_v1  ;;  %v893_v28 = vadd.f32 (!%p1245_p7), %v1984_v19, %v854_v11  ;;  %v863_v41 = vld [vmem:[#allocation2 + $0xe8] sm:$0xff] (!%p1245_p7) }
 0x185   : > { %1396 = vst [vmem:[%s1923_s23 + $0x20] sm:$0xff] %v1336_v7   ;;  %v921_v21 = vmax.f32 %v889_v9, 0.0  ;;  %1397 = vst [vmem:[%s1923_s23 + $0x28] sm:$0xff] %v1341_v13   ;;  %v894_v29 = vadd.f32 %v1984_v19, %v855_v12  ;;  %v924_v32 = vmax.f32 %v892_v23, 0.0  ;;  %v1371_v52 = vpack.c.bf16 %v928_v44, %v927_v43 }
 0x186   : > { %v918_v8 = vmax.f32 %v886_v0, 0.0  ;;  %v923_v27 = vmax.f32 %v891_v16, 0.0  ;;  %v925_v36 = vmax.f32 %v893_v28, 0.0  ;;  %v902_v55 = vadd.f32 %v1984_v19, %v863_v41 }
 0x187   : > { %v1356_v31 = vpack.c.bf16 %v922_v22, %v921_v21  ;;  %v926_v37 = vmax.f32 %v894_v29, 0.0  ;;  %v1376_v56 = vpack.c.bf16 %v930_v50, %v929_v49  ;;  %1403 = vst [vmem:[%s1923_s23 + $0x58] sm:$0xff] %v1371_v52  }
 0x188   : > { %v1346_v20 = vpack.c.bf16 %v918_v8, %v917_v3  ;;  %v1361_v42 = vpack.c.bf16 %v924_v32, %v923_v27  ;;  %v934_v61 = vmax.f32 %v902_v55, 0.0 }
 0x189   : > { %v848_v53 = vld [vmem:[#allocation2 + $0x70] sm:$0xff]  ;;  %1400 = vst [vmem:[%s1923_s23 + $0x40] sm:$0xff] %v1356_v31   ;;  %v1366_v48 = vpack.c.bf16 %v926_v37, %v925_v36  ;;  %1404 = vst [vmem:[%s1923_s23 + $0x60] sm:$0xff] %v1376_v56  }
 0x18a   : > { %v887_v4 = vadd.f32 %v1984_v19, %v848_v53  ;;  %1398 = vst [vmem:[%s1923_s23 + $0x30] sm:$0xff] %v1346_v20   ;;  %v864_v46 = vld [vmem:[#allocation2 + $0xf0] sm:$0xff]  ;;  %1401 = vst [vmem:[%s1923_s23 + $0x48] sm:$0xff] %v1361_v42   ;;  %v931_v53 = vmax.f32 %v899_v45, 0.0 }
 0x18b   : > { %v849_v54 = vld [vmem:[#allocation2 + $0x78] sm:$0xff]  ;;  %1402 = vst [vmem:[%s1923_s23 + $0x50] sm:$0xff] %v1366_v48   ;;  %v903_v58 = vadd.f32 %v1984_v19, %v864_v46 }
 0x18c   : > { %v888_v5 = vadd.f32 %v1984_v19, %v849_v54  ;;  %v919_v14 = vmax.f32 %v887_v4, 0.0  ;;  %v865_v47 = vld [vmem:[#allocation2 + $0xf8] sm:$0xff]  ;;  %v901_v54 = vadd.f32 %v1984_v19, %v862_v40  ;;  %v1381_v62 = vpack.c.bf16 %v932_v57, %v931_v53 }
 0x18d   : > { %v904_v59 = vadd.f32 %v1984_v19, %v865_v47  ;;  %v935_v63 = vmax.f32 %v903_v58, 0.0 }
 0x18e   : > { %v920_v15 = vmax.f32 %v888_v5, 0.0  ;;  %v933_v60 = vmax.f32 %v901_v54, 0.0  ;;  %1405 = vst [vmem:[%s1923_s23 + $0x68] sm:$0xff] %v1381_v62  }
 0x18f   : > { %v936_v0 = vmax.f32 %v904_v59, 0.0 }
 0x190   : > { %v1351_v26 = vpack.c.bf16 %v920_v15, %v919_v14  ;;  %v1386_v1 = vpack.c.bf16 %v934_v61, %v933_v60 }
 0x191   : > { %v1391_v2 = vpack.c.bf16 %v936_v0, %v935_v63 }
 0x192   : > { %1399 = vst [vmem:[%s1923_s23 + $0x38] sm:$0xff] %v1351_v26   ;;  %1406 = vst [vmem:[%s1923_s23 + $0x70] sm:$0xff] %v1386_v1  }
 0x193   : > { %1407 = vst [vmem:[%s1923_s23 + $0x78] sm:$0xff] %v1391_v2  }
 0x194 PF: > { %s16_s19 = sadd.s32 1, %s1772_s19   ;;  %s2065_s12 = smov %s1748_s13 }
 0x195   : > { %p13_p6 = scmp.ge.s32.totalorder %s16_s19, 11   ;;  %s2066_s13 = smov %s1752_s14 }
 0x196   : > { %s2067_s14 = smov %s1866_s5  ;;  %s2068_s15 = smov %s1764_s17 }
 0x197   : > { %s2069_s16 = smov %s1768_s18  ;;  %s2070_s17 = smov %s2073_s21 }
 0x198   : > { %s2071_s18 = smov %s2077_s22  ;;  %15 = sbr.rel (!%p13_p6) target bundleno = 5 (0x5), region = 81 }
 0x19f   :  { %1119 = vsyncpa [#allocation4], 1 }
 0x1a0   :  { %1121 = vsyncpa [#allocation4 + $0x1], 1 }

// kernel: gcn_net_exp.7
= control target key start
LH: loop header
LB: loop body
LE: loop exit
PB: predicated region body
PF: predicated region fallthrough
CT: control target
= control target key end

     0   :  { %s1806_s12 = smov 0   ;;  %s1808_s13 = smov 0   ;;  %s2091_s0 = inlined_call_operand.vmem [shape: bf16[768,768], index: 0, kind: input, shape index: {}]   ;;  %s2092_s1 = inlined_call_operand.vmem [shape: bf16[768,128], index: 1, kind: input, shape index: {}]   ;;  %s2093_s2 = inlined_call_operand.vmem [shape: f32[1,128], index: 2, kind: input, shape index: {}]   ;;  %s2094_s3 = inlined_call_operand.vmem [shape: f32[768,128], index: 3, kind: output, shape index: {}]  }
   0x1   :  { %s1810_s14 = smov 0   ;;  %s1812_s15 = smov 0  }
   0x2   :  { %s1814_s16 = smov 0   ;;  %s1816_s17 = smov 0  }
   0x3   :  { %s1818_s18 = smov 0  }
   0x4 LB: > { %s22_s19 = sadd.s32 1, %s1775_s16  ;;  %s25_s20 = sadd.s32 1, %s1779_s17  ;;  %s1783_s18 = sphi %s1818_s18, %s13_s18   ;;  %s1779_s17 = sphi %s1816_s17, %s2100_s17   ;;  %s1775_s16 = sphi %s1814_s16, %s2099_s16   ;;  %s1771_s15 = sphi %s1812_s15, %s2098_s15   ;;  %s1767_s14 = sphi %s1810_s14, %s2097_s14   ;;  %s1763_s13 = sphi %s1808_s13, %s2096_s13   ;;  %s1759_s12 = sphi %s1806_s12, %s2095_s12  }
   0x5   : > { %p23_p0 = scmp.ge.s32.totalorder %s22_s19, 3  ;;  %p41_p1 = scmp.ne.s32.totalorder %s1763_s13, %s1759_s12 }
   0x6   : > { %p42_p2 = scmp.eq.s32.totalorder %s1783_s18, 0  ;;  %s34_s24 = sadd.s32 1, %s1763_s13 }
   0x7   : > { %s2102_s19 = smov (%p23_p0, %s22_s19), 0  ;;  %s2104_s20 = smov (!%p23_p0, %s25_s20), %s1779_s17 }
   0x8   : > { %p43_p3 = por %p42_p2, %p41_p1  ;;  %p27_p4 = scmp.ge.s32.totalorder %s2104_s20, 3 }
   0x9   : > { %s30_s21 = ssub.s32 %s1775_s16, %s2102_s19  ;;  %p1318_p6 = scmp.ge.s32.totalorder %s1783_s18, 9 }
   0xa   : > { %s2106_s20 = smov (%p27_p4, %s2104_s20), 0 }
   0xb   : > { %s29_s22 = ssub.s32 %s1779_s17, %s2106_s20  ;;  %141 = sbr.rel (%p1318_p6) target bundleno = 42 (0x2a), region = 24 }
   0xc   : > { %s31_s23 = sor.u32 %s30_s21, %s29_s22 }
   0xd   : > { %p32_p5 = scmp.eq.s32.totalorder %s31_s23, 0 }
   0xf   : > { %s1857_s25 = scalar_select %p32_p5, %s1763_s13, %s34_s24  }
  0x12   : > { %144 = sbr.rel (!%p43_p3) target bundleno = 42 (0x2a), region = 28  ;;  %s146_s26 = sand.u32 (%p43_p3), 1, %s1763_s13  }
  0x13   : > { %s1321_s27 = sshll.u32 (%p43_p3), %s1775_s16, 1  ;;  %s1319_s28 = sshll.u32 (%p43_p3), %s146_s26, 8 }
  0x14   : > { %s1543_s29 = smul.u32 (%p43_p3), 192, %s1779_s17  ;;  %s1871_s8 = scalar_lea.vmem (%p43_p3), [#allocation3], %s1319_s28 }
  0x16   : > { %s152_s30 = sadd.s32 (%p43_p3), %s1543_s29, %s1321_s27 }
  0x17   : > { %s1323_s4 = sshll.u32 (%p43_p3), %s152_s30, 2 }
  0x18   : > { %s1866_s7 = scalar_lea.vmem (%p43_p3), %s2091_s0, %s1323_s4 }
  0x19   : > { %v244_v0 = vld [vmem:[%s1866_s7] sm:$0xff]  ;;  %v246_v1 = vld [vmem:[%s1866_s7 + $0x18] sm:$0xff]  ;;  %v248_v2 = vld [vmem:[%s1866_s7 + $0x30] sm:$0xff] }
  0x1a   : > { %245 = vst [vmem:[%s1871_s8] sm:$0xff] %v244_v0  ;;  %247 = vst [vmem:[%s1871_s8 + $0x8] sm:$0xff] %v246_v1  ;;  %v250_v3 = vld [vmem:[%s1866_s7 + $0x48] sm:$0xff]  ;;  %v252_v4 = vld [vmem:[%s1866_s7 + $0x60] sm:$0xff] }
  0x1b   : > { %249 = vst [vmem:[%s1871_s8 + $0x10] sm:$0xff] %v248_v2  ;;  %v254_v5 = vld [vmem:[%s1866_s7 + $0x78] sm:$0xff]  ;;  %251 = vst [vmem:[%s1871_s8 + $0x18] sm:$0xff] %v250_v3  ;;  %v256_v6 = vld [vmem:[%s1866_s7 + $0x90] sm:$0xff] }
  0x1c   : > { %253 = vst [vmem:[%s1871_s8 + $0x20] sm:$0xff] %v252_v4  ;;  %255 = vst [vmem:[%s1871_s8 + $0x28] sm:$0xff] %v254_v5  ;;  %v258_v7 = vld [vmem:[%s1866_s7 + $0xa8] sm:$0xff]  ;;  %v260_v8 = vld [vmem:[%s1866_s7 + $0xc0] sm:$0xff] }
  0x1d   : > { %257 = vst [vmem:[%s1871_s8 + $0x30] sm:$0xff] %v256_v6  ;;  %259 = vst [vmem:[%s1871_s8 + $0x38] sm:$0xff] %v258_v7  ;;  %v262_v9 = vld [vmem:[%s1866_s7 + $0xd8] sm:$0xff]  ;;  %v264_v10 = vld [vmem:[%s1866_s7 + $0xf0] sm:$0xff] }
  0x1e   : > { %261 = vst [vmem:[%s1871_s8 + $0x40] sm:$0xff] %v260_v8  ;;  %v266_v11 = vld [vmem:[%s1866_s7 + $0x108] sm:$0xff]  ;;  %263 = vst [vmem:[%s1871_s8 + $0x48] sm:$0xff] %v262_v9  ;;  %v268_v12 = vld [vmem:[%s1866_s7 + $0x120] sm:$0xff] }
  0x1f   : > { %265 = vst [vmem:[%s1871_s8 + $0x50] sm:$0xff] %v264_v10  ;;  %267 = vst [vmem:[%s1871_s8 + $0x58] sm:$0xff] %v266_v11  ;;  %v270_v13 = vld [vmem:[%s1866_s7 + $0x138] sm:$0xff]  ;;  %v272_v14 = vld [vmem:[%s1866_s7 + $0x150] sm:$0xff] }
  0x20   : > { %269 = vst [vmem:[%s1871_s8 + $0x60] sm:$0xff] %v268_v12  ;;  %271 = vst [vmem:[%s1871_s8 + $0x68] sm:$0xff] %v270_v13  ;;  %v274_v15 = vld [vmem:[%s1866_s7 + $0x168] sm:$0xff]  ;;  %v276_v16 = vld [vmem:[%s1866_s7 + $0x180] sm:$0xff] }
  0x21   : > { %273 = vst [vmem:[%s1871_s8 + $0x70] sm:$0xff] %v272_v14  ;;  %v278_v17 = vld [vmem:[%s1866_s7 + $0x198] sm:$0xff]  ;;  %275 = vst [vmem:[%s1871_s8 + $0x78] sm:$0xff] %v274_v15  ;;  %v280_v18 = vld [vmem:[%s1866_s7 + $0x1b0] sm:$0xff] }
  0x22   : > { %277 = vst [vmem:[%s1871_s8 + $0x80] sm:$0xff] %v276_v16  ;;  %279 = vst [vmem:[%s1871_s8 + $0x88] sm:$0xff] %v278_v17  ;;  %v282_v19 = vld [vmem:[%s1866_s7 + $0x1c8] sm:$0xff]  ;;  %v284_v20 = vld [vmem:[%s1866_s7 + $0x1e0] sm:$0xff] }
  0x23   : > { %281 = vst [vmem:[%s1871_s8 + $0x90] sm:$0xff] %v280_v18  ;;  %283 = vst [vmem:[%s1871_s8 + $0x98] sm:$0xff] %v282_v19  ;;  %v286_v21 = vld [vmem:[%s1866_s7 + $0x1f8] sm:$0xff]  ;;  %v288_v22 = vld [vmem:[%s1866_s7 + $0x210] sm:$0xff] }
  0x24   : > { %285 = vst [vmem:[%s1871_s8 + $0xa0] sm:$0xff] %v284_v20  ;;  %v290_v23 = vld [vmem:[%s1866_s7 + $0x228] sm:$0xff]  ;;  %287 = vst [vmem:[%s1871_s8 + $0xa8] sm:$0xff] %v286_v21  ;;  %v292_v24 = vld [vmem:[%s1866_s7 + $0x240] sm:$0xff] }
  0x25   : > { %289 = vst [vmem:[%s1871_s8 + $0xb0] sm:$0xff] %v288_v22  ;;  %291 = vst [vmem:[%s1871_s8 + $0xb8] sm:$0xff] %v290_v23  ;;  %v294_v25 = vld [vmem:[%s1866_s7 + $0x258] sm:$0xff]  ;;  %v296_v26 = vld [vmem:[%s1866_s7 + $0x270] sm:$0xff] }
  0x26   : > { %293 = vst [vmem:[%s1871_s8 + $0xc0] sm:$0xff] %v292_v24  ;;  %295 = vst [vmem:[%s1871_s8 + $0xc8] sm:$0xff] %v294_v25  ;;  %v298_v27 = vld [vmem:[%s1866_s7 + $0x288] sm:$0xff]  ;;  %v300_v28 = vld [vmem:[%s1866_s7 + $0x2a0] sm:$0xff] }
  0x27   : > { %297 = vst [vmem:[%s1871_s8 + $0xd0] sm:$0xff] %v296_v26  ;;  %v302_v29 = vld [vmem:[%s1866_s7 + $0x2b8] sm:$0xff]  ;;  %299 = vst [vmem:[%s1871_s8 + $0xd8] sm:$0xff] %v298_v27  ;;  %v304_v30 = vld [vmem:[%s1866_s7 + $0x2d0] sm:$0xff] }
  0x28   : > { %301 = vst [vmem:[%s1871_s8 + $0xe0] sm:$0xff] %v300_v28  ;;  %303 = vst [vmem:[%s1871_s8 + $0xe8] sm:$0xff] %v302_v29  ;;  %v306_v31 = vld [vmem:[%s1866_s7 + $0x2e8] sm:$0xff] }
  0x29   : > { %305 = vst [vmem:[%s1871_s8 + $0xf0] sm:$0xff] %v304_v30  ;;  %307 = vst [vmem:[%s1871_s8 + $0xf8] sm:$0xff] %v306_v31 }
  0x2a PF: > { %p1324_p7 = scmp.ge.s32.totalorder %s1783_s18, 1  ;;  %p312_p8 = scmp.lt.s32.totalorder %s1783_s18, 10 }
  0x2c   : > { %p313_p9 = pnand %p1324_p7, %p312_p8 }
  0x2d   : > { %s319_s9 = sand.u32 (!%p313_p9), 1, %s1759_s12   ;;  %s1326_s10 = sshll.u32 (!%p313_p9), %s1771_s15, 5 }
  0x2e   : > { %316 = sbr.rel (%p313_p9) target bundleno = 427 (0x1ab), region = 66  ;;  %s1325_s11 = sshll.u32 (!%p313_p9), %s319_s9, 8 }
  0x2f   : > { %p345_p10 = scmp.lt.s32.totalorder (!%p313_p9), %s1326_s10, 95  ;;  %s1943_s26 = scalar_lea.vmem (!%p313_p9), [#allocation3], %s1325_s11 }
  0x30   : > { %p1328_p11 = scmp.ne.s32.totalorder (!%p313_p9), %s1767_s14, 0 }
  0x35   : > { %s2108_s10 = smov (!%p345_p10, %s1326_s10), 95  ;;  %354 = sbr.rel (%p1328_p11) target bundleno = 71 (0x47), region = 74 }
  0x36   : > { %s1327_s21 = sshll.u32 %s2108_s10, 3  ;;  %v1785_v32 = vmov (!%p1328_p11), 0.0  }
  0x37   : > { %s1941_s24 = scalar_lea.vmem %s2094_s3, %s1327_s21  ;;  %355 = vst [vmem:[#allocation2] sm:$0xff] (!%p1328_p11), %v1785_v32  ;;  %356 = vst [vmem:[#allocation2 + $0x8] sm:$0xff] (!%p1328_p11), %v1785_v32 }
  0x38   : > { %357 = vst [vmem:[#allocation2 + $0x10] sm:$0xff] (!%p1328_p11), %v1785_v32  ;;  %358 = vst [vmem:[#allocation2 + $0x18] sm:$0xff] (!%p1328_p11), %v1785_v32 }
  0x39   : > { %359 = vst [vmem:[#allocation2 + $0x20] sm:$0xff] (!%p1328_p11), %v1785_v32  ;;  %360 = vst [vmem:[#allocation2 + $0x28] sm:$0xff] (!%p1328_p11), %v1785_v32 }
  0x3a   : > { %361 = vst [vmem:[#allocation2 + $0x30] sm:$0xff] (!%p1328_p11), %v1785_v32  ;;  %362 = vst [vmem:[#allocation2 + $0x38] sm:$0xff] (!%p1328_p11), %v1785_v32 }
  0x3b   : > { %363 = vst [vmem:[#allocation2 + $0x40] sm:$0xff] (!%p1328_p11), %v1785_v32  ;;  %364 = vst [vmem:[#allocation2 + $0x48] sm:$0xff] (!%p1328_p11), %v1785_v32 }
  0x3c   : > { %365 = vst [vmem:[#allocation2 + $0x50] sm:$0xff] %v1785_v32  ;;  %366 = vst [vmem:[#allocation2 + $0x58] sm:$0xff] %v1785_v32 }
  0x3d   : > { %367 = vst [vmem:[#allocation2 + $0x60] sm:$0xff] %v1785_v32  ;;  %368 = vst [vmem:[#allocation2 + $0x68] sm:$0xff] %v1785_v32 }
  0x3e   : > { %369 = vst [vmem:[#allocation2 + $0x70] sm:$0xff] %v1785_v32  ;;  %370 = vst [vmem:[#allocation2 + $0x78] sm:$0xff] %v1785_v32 }
  0x3f   : > { %371 = vst [vmem:[#allocation2 + $0x80] sm:$0xff] %v1785_v32  ;;  %372 = vst [vmem:[#allocation2 + $0x88] sm:$0xff] %v1785_v32 }
  0x40   : > { %373 = vst [vmem:[#allocation2 + $0x90] sm:$0xff] %v1785_v32  ;;  %374 = vst [vmem:[#allocation2 + $0x98] sm:$0xff] %v1785_v32 }
  0x41   : > { %375 = vst [vmem:[#allocation2 + $0xa0] sm:$0xff] %v1785_v32  ;;  %376 = vst [vmem:[#allocation2 + $0xa8] sm:$0xff] %v1785_v32 }
  0x42   : > { %377 = vst [vmem:[#allocation2 + $0xb0] sm:$0xff] %v1785_v32  ;;  %378 = vst [vmem:[#allocation2 + $0xb8] sm:$0xff] %v1785_v32 }
  0x43   : > { %379 = vst [vmem:[#allocation2 + $0xc0] sm:$0xff] %v1785_v32  ;;  %380 = vst [vmem:[#allocation2 + $0xc8] sm:$0xff] %v1785_v32 }
  0x44   : > { %381 = vst [vmem:[#allocation2 + $0xd0] sm:$0xff] %v1785_v32  ;;  %382 = vst [vmem:[#allocation2 + $0xd8] sm:$0xff] %v1785_v32 }
  0x45   : > { %383 = vst [vmem:[#allocation2 + $0xe0] sm:$0xff] %v1785_v32  ;;  %384 = vst [vmem:[#allocation2 + $0xe8] sm:$0xff] %v1785_v32 }
  0x46   : > { %385 = vst [vmem:[#allocation2 + $0xf0] sm:$0xff] %v1785_v32  ;;  %386 = vst [vmem:[#allocation2 + $0xf8] sm:$0xff] %v1785_v32 }
  0x47 PF: > { %s1329_s12 = sshll.u32 %s1767_s14, 8  ;;  %v1619_v33 = vld [vmem:[%s1943_s26 + $0x4] ss:$8 sps:$4 sm:$0xff]   ;;  %v1617_v51 = vld [vmem:[%s1943_s26] ss:$8 sps:$4 sm:$0xff]   ;;  %p1379_p12 = scmp.ne.s32.totalorder %s1767_s14, 2 }
  0x48   : > { %s452_s15 = sshra.s32 %s1329_s12, 3  ;;  %v1622_v34 = vld [vmem:[%s1943_s26 + $0x84] ss:$8 sps:$4 sm:$0xff]   ;;  %776 = vmatprep.mubr.bf16.mxu0 %v1619_v33  ;;  %v1620_v52 = vld [vmem:[%s1943_s26 + $0x80] ss:$8 sps:$4 sm:$0xff]  }
  0x49   : > { %s1330_s27 = sshll.u32 %s452_s15, 2  ;;  %840 = vmatprep.mubr.bf16.mxu1 %v1622_v34  ;;  %v1623_v53 = vld [vmem:[%s1943_s26 + $0x14] ss:$8 sps:$4 sm:$0xff]   ;;  %v1627_v55 = vld [vmem:[%s1943_s26 + $0x10] ss:$8 sps:$4 sm:$0xff]   ;;  %v388_v19 = vld [vmem:[#allocation2] sm:$0xff] }
  0x4a   : > { %s1952_s30 = scalar_lea.vmem %s2092_s1, %s1330_s27  ;;  %v1625_v54 = vld [vmem:[%s1943_s26 + $0x94] ss:$8 sps:$4 sm:$0xff]   ;;  %v1628_v56 = vld [vmem:[%s1943_s26 + $0x90] ss:$8 sps:$4 sm:$0xff]   ;;  %v1629_v57 = vld [vmem:[%s1943_s26 + $0x24] ss:$8 sps:$4 sm:$0xff]  }
  0x4b   : > { %v1601_v35 = vld [vmem:[%s1952_s30 + $0x40] sm:$0xff]   ;;  %v1603_v37 = vld [vmem:[%s1952_s30 + $0x48] sm:$0xff]   ;;  %v1605_v39 = vld [vmem:[%s1952_s30 + $0x50] sm:$0xff]  }
  0x4c   : > { %v1602_v36 = vld [vmem:[%s1952_s30] sm:$0xff]   ;;  %1415 = vmatprep.subr.bf16.mxu0 %v1601_v35  ;;  %1527 = vmatprep.subr.bf16.mxu1 %v1601_v35  ;;  %v1604_v38 = vld [vmem:[%s1952_s30 + $0x8] sm:$0xff]   ;;  %v1606_v40 = vld [vmem:[%s1952_s30 + $0x10] sm:$0xff]  }
  0x4d   : > { %1416 = vmatpush3.bf16.msra.mxu0 %v1602_v36  ;;  %1535 = vmatpush3.bf16.msra.mxu1 %v1602_v36  ;;  %v1607_v41 = vld [vmem:[%s1952_s30 + $0x58] sm:$0xff]   ;;  %v1609_v43 = vld [vmem:[%s1952_s30 + $0x60] sm:$0xff]   ;;  %v1611_v45 = vld [vmem:[%s1952_s30 + $0x68] sm:$0xff]  }
  0x4e   : > { %1417 = vmatprep.subr.bf16.mxu0 %v1603_v37  ;;  %1528 = vmatprep.subr.bf16.mxu1 %v1603_v37  ;;  %v1608_v42 = vld [vmem:[%s1952_s30 + $0x18] sm:$0xff]   ;;  %v1610_v44 = vld [vmem:[%s1952_s30 + $0x20] sm:$0xff]   ;;  %v1612_v46 = vld [vmem:[%s1952_s30 + $0x28] sm:$0xff]  }
  0x4f   : > { %v1613_v47 = vld [vmem:[%s1952_s30 + $0x70] sm:$0xff]   ;;  %v1615_v49 = vld [vmem:[%s1952_s30 + $0x78] sm:$0xff]   ;;  %v1631_v58 = vld [vmem:[%s1943_s26 + $0xa4] ss:$8 sps:$4 sm:$0xff]  }
  0x50   : > { %v1614_v48 = vld [vmem:[%s1952_s30 + $0x30] sm:$0xff]   ;;  %v1616_v50 = vld [vmem:[%s1952_s30 + $0x38] sm:$0xff]   ;;  %v1633_v59 = vld [vmem:[%s1943_s26 + $0x20] ss:$8 sps:$4 sm:$0xff]  }
  0x51   : > { %1418 = vmatpush3.bf16.msra.mxu0 %v1604_v38  ;;  %1536 = vmatpush3.bf16.msra.mxu1 %v1604_v38  ;;  %v1634_v60 = vld [vmem:[%s1943_s26 + $0xa0] ss:$8 sps:$4 sm:$0xff]   ;;  %v1635_v61 = vld [vmem:[%s1943_s26 + $0x34] ss:$8 sps:$4 sm:$0xff]   ;;  %v1639_v63 = vld [vmem:[%s1943_s26 + $0x30] ss:$8 sps:$4 sm:$0xff]  }
  0x52   : > { %1419 = vmatprep.subr.bf16.mxu0 %v1605_v39  ;;  %1529 = vmatprep.subr.bf16.mxu1 %v1605_v39  ;;  %v1637_v62 = vld [vmem:[%s1943_s26 + $0xb4] ss:$8 sps:$4 sm:$0xff]   ;;  %v1640_v0 = vld [vmem:[%s1943_s26 + $0xb0] ss:$8 sps:$4 sm:$0xff]   ;;  %v1641_v1 = vld [vmem:[%s1943_s26 + $0x44] ss:$8 sps:$4 sm:$0xff]  }
  0x53   : > { %v1643_v2 = vld [vmem:[%s1943_s26 + $0xc4] ss:$8 sps:$4 sm:$0xff]   ;;  %v1645_v3 = vld [vmem:[%s1943_s26 + $0x40] ss:$8 sps:$4 sm:$0xff]   ;;  %v1647_v5 = vld [vmem:[%s1943_s26 + $0x54] ss:$8 sps:$4 sm:$0xff]  }
  0x54   : > { %v1646_v4 = vld [vmem:[%s1943_s26 + $0xc0] ss:$8 sps:$4 sm:$0xff]   ;;  %v1649_v6 = vld [vmem:[%s1943_s26 + $0xd4] ss:$8 sps:$4 sm:$0xff]   ;;  %v1651_v7 = vld [vmem:[%s1943_s26 + $0x50] ss:$8 sps:$4 sm:$0xff]  }
  0x55   : > { %1420 = vmatpush3.bf16.msra.mxu0 %v1606_v40  ;;  %1537 = vmatpush3.bf16.msra.mxu1 %v1606_v40  ;;  %v1652_v8 = vld [vmem:[%s1943_s26 + $0xd0] ss:$8 sps:$4 sm:$0xff]   ;;  %v1653_v9 = vld [vmem:[%s1943_s26 + $0x64] ss:$8 sps:$4 sm:$0xff]   ;;  %v1657_v11 = vld [vmem:[%s1943_s26 + $0x60] ss:$8 sps:$4 sm:$0xff]  }
  0x56   : > { %1421 = vmatprep.subr.bf16.mxu0 %v1607_v41  ;;  %1530 = vmatprep.subr.bf16.mxu1 %v1607_v41  ;;  %v1655_v10 = vld [vmem:[%s1943_s26 + $0xe4] ss:$8 sps:$4 sm:$0xff]   ;;  %v1658_v12 = vld [vmem:[%s1943_s26 + $0xe0] ss:$8 sps:$4 sm:$0xff]   ;;  %v1659_v13 = vld [vmem:[%s1943_s26 + $0x74] ss:$8 sps:$4 sm:$0xff]  }
  0x57   : > { %v1661_v14 = vld [vmem:[%s1943_s26 + $0xf4] ss:$8 sps:$4 sm:$0xff]   ;;  %v1663_v15 = vld [vmem:[%s1943_s26 + $0x70] ss:$8 sps:$4 sm:$0xff]   ;;  %v404_v21 = vld [vmem:[#allocation2 + $0x80] sm:$0xff] }
  0x58   : > { %v1664_v16 = vld [vmem:[%s1943_s26 + $0xf0] ss:$8 sps:$4 sm:$0xff]   ;;  %v389_v27 = vld [vmem:[#allocation2 + $0x8] sm:$0xff] }
  0x59   : > { %1422 = vmatpush3.bf16.msra.mxu0 %v1608_v42  ;;  %1538 = vmatpush3.bf16.msra.mxu1 %v1608_v42  ;;  %v405_v29 = vld [vmem:[#allocation2 + $0x88] sm:$0xff]  ;;  %v390_v39 = vld [vmem:[#allocation2 + $0x10] sm:$0xff] }
  0x5a   : > { %1423 = vmatprep.subr.bf16.mxu0 %v1609_v43  ;;  %1531 = vmatprep.subr.bf16.mxu1 %v1609_v43  ;;  %v406_v41 = vld [vmem:[#allocation2 + $0x90] sm:$0xff] }
  0x5d   : > { %1424 = vmatpush3.bf16.msra.mxu0 %v1610_v44  ;;  %1539 = vmatpush3.bf16.msra.mxu1 %v1610_v44 }
  0x5e   : > { %1425 = vmatprep.subr.bf16.mxu0 %v1611_v45  ;;  %1532 = vmatprep.subr.bf16.mxu1 %v1611_v45 }
  0x61   : > { %1426 = vmatpush3.bf16.msra.mxu0 %v1612_v46  ;;  %1540 = vmatpush3.bf16.msra.mxu1 %v1612_v46 }
  0x62   : > { %1427 = vmatprep.subr.bf16.mxu0 %v1613_v47  ;;  %1533 = vmatprep.subr.bf16.mxu1 %v1613_v47  ;;  %v391_v47 = vld [vmem:[#allocation2 + $0x18] sm:$0xff] }
  0x65   : > { %1428 = vmatpush3.bf16.msra.mxu0 %v1614_v48  ;;  %1541 = vmatpush3.bf16.msra.mxu1 %v1614_v48 }
  0x66   : > { %1429 = vmatprep.subr.bf16.mxu0 %v1615_v49  ;;  %1534 = vmatprep.subr.bf16.mxu1 %v1615_v49  ;;  %v407_v49 = vld [vmem:[#allocation2 + $0x98] sm:$0xff] }
  0x69   : > { %1430 = vmatpush3.bf16.msra.mxu0 %v1616_v50  ;;  %1542 = vmatpush3.bf16.msra.mxu1 %v1616_v50 }
  0x6c   : > { %777 = vmatmul.mubr.bf16.vlgmr.msra.gmra.mrb[0].mxu0 %v1617_v51  ;;  %841 = vmatmul.mubr.bf16.vlgmr.msra.gmra.mrb[0].mxu1 %v1620_v52 }
  0x6d   : > { %784 = vmatprep.mubr.bf16.mxu0 %v1623_v53  ;;  %848 = vmatprep.mubr.bf16.mxu1 %v1625_v54 }
  0x74   : > { %785 = vmatmul.mubr.bf16.gmra.mrb[4].mxu0 %v1627_v55  ;;  %849 = vmatmul.mubr.bf16.gmra.mrb[4].mxu1 %v1628_v56 }
  0x75   : > { %792 = vmatprep.mubr.bf16.mxu0 %v1629_v57  ;;  %856 = vmatprep.mubr.bf16.mxu1 %v1631_v58 }
  0x7c   : > { %793 = vmatmul.mubr.bf16.gmra.mrb[8].mxu0 %v1633_v59  ;;  %857 = vmatmul.mubr.bf16.gmra.mrb[8].mxu1 %v1634_v60  ;;  %v392_v59 = vld [vmem:[#allocation2 + $0x20] sm:$0xff] }
  0x7d   : > { %800 = vmatprep.mubr.bf16.mxu0 %v1635_v61  ;;  %864 = vmatprep.mubr.bf16.mxu1 %v1637_v62  ;;  %v408_v61 = vld [vmem:[#allocation2 + $0xa0] sm:$0xff] }
  0x84   : > { %801 = vmatmul.mubr.bf16.gmra.mrb[12].mxu0 %v1639_v63  ;;  %865 = vmatmul.mubr.bf16.gmra.mrb[12].mxu1 %v1640_v0 }
  0x85   : > { %808 = vmatprep.mubr.bf16.mxu0 %v1641_v1  ;;  %872 = vmatprep.mubr.bf16.mxu1 %v1643_v2 }
  0x8c   : > { %809 = vmatmul.mubr.bf16.gmra.mrb[16].mxu0 %v1645_v3  ;;  %873 = vmatmul.mubr.bf16.gmra.mrb[16].mxu1 %v1646_v4  ;;  %v393_v3 = vld [vmem:[#allocation2 + $0x28] sm:$0xff] }
  0x8d   : > { %816 = vmatprep.mubr.bf16.mxu0 %v1647_v5  ;;  %880 = vmatprep.mubr.bf16.mxu1 %v1649_v6  ;;  %v409_v5 = vld [vmem:[#allocation2 + $0xa8] sm:$0xff] }
  0x94   : > { %817 = vmatmul.mubr.bf16.gmra.mrb[20].mxu0 %v1651_v7  ;;  %881 = vmatmul.mubr.bf16.gmra.mrb[20].mxu1 %v1652_v8 }
  0x95   : > { %824 = vmatprep.mubr.bf16.mxu0 %v1653_v9  ;;  %888 = vmatprep.mubr.bf16.mxu1 %v1655_v10 }
  0x9c   : > { %825 = vmatmul.mubr.bf16.gmra.mrb[24].mxu0 %v1657_v11  ;;  %889 = vmatmul.mubr.bf16.gmra.mrb[24].mxu1 %v1658_v12 }
  0x9d   : > { %832 = vmatprep.mubr.bf16.mxu0 %v1659_v13  ;;  %896 = vmatprep.mubr.bf16.mxu1 %v1661_v14 }
  0xa4   : > { %833 = vmatmul.mubr.bf16.gmra.mrb[28].mxu0 %v1663_v15  ;;  %897 = vmatmul.mubr.bf16.gmra.mrb[28].mxu1 %v1664_v16  ;;  %v394_v15 = vld [vmem:[#allocation2 + $0x30] sm:$0xff] }
 0x13f   : > { %v1431_v17 = vpop.f32.mrb[0].mxu0  ;;  %v1479_v18 = vpop.f32.mrb[0].mxu1 }
 0x140   : > { %v1432_v20 = vpop.f32.mrb[1].mxu0  ;;  %v1480_v22 = vpop.f32.mrb[1].mxu1 }
 0x141   : > { %v1433_v23 = vadd.f32 %v1432_v20, %v1431_v17  ;;  %v1481_v24 = vadd.f32 %v1480_v22, %v1479_v18  ;;  %v1434_v25 = vpop.f32.mrb[2].mxu0  ;;  %v1482_v26 = vpop.f32.mrb[2].mxu1  ;;  %v410_v17 = vld [vmem:[#allocation2 + $0xb0] sm:$0xff] }
 0x142   : > { %v1435_v28 = vpop.f32.mrb[3].mxu0  ;;  %v1483_v30 = vpop.f32.mrb[3].mxu1 }
 0x143   : > { %v905_v31 = vadd.f32 %v1433_v23, %v388_v19  ;;  %v921_v32 = vadd.f32 %v1481_v24, %v404_v21  ;;  %v1436_v33 = vadd.f32 %v1435_v28, %v1434_v25  ;;  %v1484_v34 = vadd.f32 %v1483_v30, %v1482_v26  ;;  %v395_v23 = vld [vmem:[#allocation2 + $0x38] sm:$0xff] }
 0x144   : > { %v411_v25 = vld [vmem:[#allocation2 + $0xb8] sm:$0xff] }
 0x145   : > { %937 = vst [vmem:[#allocation2] sm:$0xff] %v905_v31  ;;  %953 = vst [vmem:[#allocation2 + $0x80] sm:$0xff] %v921_v32  ;;  %v906_v35 = vadd.f32 %v1436_v33, %v389_v27  ;;  %v922_v36 = vadd.f32 %v1484_v34, %v405_v29 }
 0x147   : > { %938 = vst [vmem:[#allocation2 + $0x8] sm:$0xff] %v906_v35  ;;  %954 = vst [vmem:[#allocation2 + $0x88] sm:$0xff] %v922_v36  ;;  %v1437_v37 = vpop.f32.mrb[4].mxu0  ;;  %v1485_v38 = vpop.f32.mrb[4].mxu1  ;;  %v396_v35 = vld [vmem:[#allocation2 + $0x40] sm:$0xff] }
 0x148   : > { %v1438_v40 = vpop.f32.mrb[5].mxu0  ;;  %v1486_v42 = vpop.f32.mrb[5].mxu1 }
 0x149   : > { %v1439_v43 = vadd.f32 %v1438_v40, %v1437_v37  ;;  %v1487_v44 = vadd.f32 %v1486_v42, %v1485_v38  ;;  %v1440_v45 = vpop.f32.mrb[6].mxu0  ;;  %v1488_v46 = vpop.f32.mrb[6].mxu1  ;;  %v412_v37 = vld [vmem:[#allocation2 + $0xc0] sm:$0xff] }
 0x14a   : > { %v1441_v48 = vpop.f32.mrb[7].mxu0  ;;  %v1489_v50 = vpop.f32.mrb[7].mxu1 }
 0x14b   : > { %v907_v51 = vadd.f32 %v1439_v43, %v390_v39  ;;  %v923_v52 = vadd.f32 %v1487_v44, %v406_v41  ;;  %v1442_v53 = vadd.f32 %v1441_v48, %v1440_v45  ;;  %v1490_v54 = vadd.f32 %v1489_v50, %v1488_v46  ;;  %v397_v43 = vld [vmem:[#allocation2 + $0x48] sm:$0xff] }
 0x14c   : > { %v413_v45 = vld [vmem:[#allocation2 + $0xc8] sm:$0xff] }
 0x14d   : > { %939 = vst [vmem:[#allocation2 + $0x10] sm:$0xff] %v907_v51  ;;  %955 = vst [vmem:[#allocation2 + $0x90] sm:$0xff] %v923_v52  ;;  %v908_v55 = vadd.f32 %v1442_v53, %v391_v47  ;;  %v924_v56 = vadd.f32 %v1490_v54, %v407_v49 }
 0x14f   : > { %940 = vst [vmem:[#allocation2 + $0x18] sm:$0xff] %v908_v55  ;;  %956 = vst [vmem:[#allocation2 + $0x98] sm:$0xff] %v924_v56  ;;  %v1443_v57 = vpop.f32.mrb[8].mxu0  ;;  %v1491_v58 = vpop.f32.mrb[8].mxu1  ;;  %v398_v55 = vld [vmem:[#allocation2 + $0x50] sm:$0xff] }
 0x150   : > { %v1444_v60 = vpop.f32.mrb[9].mxu0  ;;  %v1492_v62 = vpop.f32.mrb[9].mxu1 }
 0x151   : > { %v1445_v63 = vadd.f32 %v1444_v60, %v1443_v57  ;;  %v1493_v0 = vadd.f32 %v1492_v62, %v1491_v58  ;;  %v1446_v1 = vpop.f32.mrb[10].mxu0  ;;  %v1494_v2 = vpop.f32.mrb[10].mxu1  ;;  %v414_v57 = vld [vmem:[#allocation2 + $0xd0] sm:$0xff] }
 0x152   : > { %v1447_v4 = vpop.f32.mrb[11].mxu0  ;;  %v1495_v6 = vpop.f32.mrb[11].mxu1 }
 0x153   : > { %v909_v7 = vadd.f32 %v1445_v63, %v392_v59  ;;  %v925_v8 = vadd.f32 %v1493_v0, %v408_v61  ;;  %v1448_v9 = vadd.f32 %v1447_v4, %v1446_v1  ;;  %v1496_v10 = vadd.f32 %v1495_v6, %v1494_v2  ;;  %v399_v63 = vld [vmem:[#allocation2 + $0x58] sm:$0xff] }
 0x154   : > { %v415_v1 = vld [vmem:[#allocation2 + $0xd8] sm:$0xff] }
 0x155   : > { %941 = vst [vmem:[#allocation2 + $0x20] sm:$0xff] %v909_v7  ;;  %957 = vst [vmem:[#allocation2 + $0xa0] sm:$0xff] %v925_v8  ;;  %v910_v11 = vadd.f32 %v1448_v9, %v393_v3  ;;  %v926_v12 = vadd.f32 %v1496_v10, %v409_v5 }
 0x157   : > { %942 = vst [vmem:[#allocation2 + $0x28] sm:$0xff] %v910_v11  ;;  %958 = vst [vmem:[#allocation2 + $0xa8] sm:$0xff] %v926_v12  ;;  %v1449_v13 = vpop.f32.mrb[12].mxu0  ;;  %v1497_v14 = vpop.f32.mrb[12].mxu1  ;;  %v400_v11 = vld [vmem:[#allocation2 + $0x60] sm:$0xff] }
 0x158   : > { %v1450_v16 = vpop.f32.mrb[13].mxu0  ;;  %v1498_v18 = vpop.f32.mrb[13].mxu1 }
 0x159   : > { %v1451_v19 = vadd.f32 %v1450_v16, %v1449_v13  ;;  %v1499_v20 = vadd.f32 %v1498_v18, %v1497_v14  ;;  %v1452_v21 = vpop.f32.mrb[14].mxu0  ;;  %v1500_v22 = vpop.f32.mrb[14].mxu1  ;;  %v416_v13 = vld [vmem:[#allocation2 + $0xe0] sm:$0xff] }
 0x15a   : > { %v1453_v24 = vpop.f32.mrb[15].mxu0  ;;  %v1501_v26 = vpop.f32.mrb[15].mxu1 }
 0x15b   : > { %v911_v27 = vadd.f32 %v1451_v19, %v394_v15  ;;  %v927_v28 = vadd.f32 %v1499_v20, %v410_v17  ;;  %v1454_v29 = vadd.f32 %v1453_v24, %v1452_v21  ;;  %v1502_v30 = vadd.f32 %v1501_v26, %v1500_v22  ;;  %v401_v19 = vld [vmem:[#allocation2 + $0x68] sm:$0xff] }
 0x15c   : > { %v417_v21 = vld [vmem:[#allocation2 + $0xe8] sm:$0xff] }
 0x15d   : > { %943 = vst [vmem:[#allocation2 + $0x30] sm:$0xff] %v911_v27  ;;  %959 = vst [vmem:[#allocation2 + $0xb0] sm:$0xff] %v927_v28  ;;  %v912_v31 = vadd.f32 %v1454_v29, %v395_v23  ;;  %v928_v32 = vadd.f32 %v1502_v30, %v411_v25 }
 0x15f   : > { %944 = vst [vmem:[#allocation2 + $0x38] sm:$0xff] %v912_v31  ;;  %960 = vst [vmem:[#allocation2 + $0xb8] sm:$0xff] %v928_v32  ;;  %v1455_v33 = vpop.f32.mrb[16].mxu0  ;;  %v1503_v34 = vpop.f32.mrb[16].mxu1  ;;  %v402_v31 = vld [vmem:[#allocation2 + $0x70] sm:$0xff] }
 0x160   : > { %v1456_v36 = vpop.f32.mrb[17].mxu0  ;;  %v1504_v38 = vpop.f32.mrb[17].mxu1 }
 0x161   : > { %v1457_v39 = vadd.f32 %v1456_v36, %v1455_v33  ;;  %v1505_v40 = vadd.f32 %v1504_v38, %v1503_v34  ;;  %v1458_v41 = vpop.f32.mrb[18].mxu0  ;;  %v1506_v42 = vpop.f32.mrb[18].mxu1  ;;  %v418_v33 = vld [vmem:[#allocation2 + $0xf0] sm:$0xff] }
 0x162   : > { %v1459_v44 = vpop.f32.mrb[19].mxu0  ;;  %v1507_v46 = vpop.f32.mrb[19].mxu1 }
 0x163   : > { %v913_v47 = vadd.f32 %v1457_v39, %v396_v35  ;;  %v929_v48 = vadd.f32 %v1505_v40, %v412_v37  ;;  %v1460_v49 = vadd.f32 %v1459_v44, %v1458_v41  ;;  %v1508_v50 = vadd.f32 %v1507_v46, %v1506_v42  ;;  %v403_v39 = vld [vmem:[#allocation2 + $0x78] sm:$0xff] }
 0x164   : > { %v419_v41 = vld [vmem:[#allocation2 + $0xf8] sm:$0xff] }
 0x165   : > { %945 = vst [vmem:[#allocation2 + $0x40] sm:$0xff] %v913_v47  ;;  %961 = vst [vmem:[#allocation2 + $0xc0] sm:$0xff] %v929_v48  ;;  %v914_v51 = vadd.f32 %v1460_v49, %v397_v43  ;;  %v930_v52 = vadd.f32 %v1508_v50, %v413_v45  ;;  %v973_v49 = vld [vmem:[#allocation2] sm:$0xff] (!%p1379_p12) }
 0x166   : > { %v2004_v50 = vld [vmem:[%s2093_s2] ss:$0 sm:$0xff] (!%p1379_p12) }
 0x167   : > { %946 = vst [vmem:[#allocation2 + $0x48] sm:$0xff] %v914_v51  ;;  %962 = vst [vmem:[#allocation2 + $0xc8] sm:$0xff] %v930_v52  ;;  %v1461_v53 = vpop.f32.mrb[20].mxu0  ;;  %v1509_v54 = vpop.f32.mrb[20].mxu1  ;;  %v974_v51 = vld [vmem:[#allocation2 + $0x8] sm:$0xff] (!%p1379_p12)  ;;  %v1012_v52 = vadd.f32 (!%p1379_p12), %v2004_v50, %v973_v49 }
 0x168   : > { %v1462_v56 = vpop.f32.mrb[21].mxu0  ;;  %v1510_v58 = vpop.f32.mrb[21].mxu1 }
 0x169   : > { %v1463_v59 = vadd.f32 %v1462_v56, %v1461_v53  ;;  %v1511_v60 = vadd.f32 %v1510_v58, %v1509_v54  ;;  %v1464_v61 = vpop.f32.mrb[22].mxu0  ;;  %v1512_v62 = vpop.f32.mrb[22].mxu1  ;;  %v1013_v53 = vadd.f32 (!%p1379_p12), %v2004_v50, %v974_v51  ;;  %v975_v54 = vld [vmem:[#allocation2 + $0x10] sm:$0xff] (!%p1379_p12)  ;;  %v977_v56 = vld [vmem:[#allocation2 + $0x20] sm:$0xff] (!%p1379_p12)  ;;  %v992_v51 = vld [vmem:[#allocation2 + $0x98] sm:$0xff] (!%p1379_p12) }
 0x16a   : > { %v1465_v0 = vpop.f32.mrb[23].mxu0  ;;  %v1513_v2 = vpop.f32.mrb[23].mxu1 }
 0x16b   : > { %v915_v3 = vadd.f32 %v1463_v59, %v398_v55  ;;  %v931_v4 = vadd.f32 %v1511_v60, %v414_v57  ;;  %v1466_v5 = vadd.f32 %v1465_v0, %v1464_v61  ;;  %v1514_v6 = vadd.f32 %v1513_v2, %v1512_v62  ;;  %v976_v55 = vld [vmem:[#allocation2 + $0x18] sm:$0xff] (!%p1379_p12)  ;;  %v978_v60 = vld [vmem:[#allocation2 + $0x28] sm:$0xff] (!%p1379_p12)  ;;  %v979_v61 = vld [vmem:[#allocation2 + $0x30] sm:$0xff] (!%p1379_p12) }
 0x16c   : > { %v1014_v57 = vadd.f32 (!%p1379_p12), %v2004_v50, %v975_v54  ;;  %v1015_v58 = vadd.f32 (!%p1379_p12), %v2004_v50, %v976_v55  ;;  %v1016_v59 = vadd.f32 (!%p1379_p12), %v2004_v50, %v977_v56  ;;  %v980_v62 = vld [vmem:[#allocation2 + $0x38] sm:$0xff] (!%p1379_p12)  ;;  %v1382_v0 = vclamps-f32 (!%p1379_p12), %v1013_v53, 20.0 }
 0x16d   : > { %947 = vst [vmem:[#allocation2 + $0x50] sm:$0xff] %v915_v3  ;;  %963 = vst [vmem:[#allocation2 + $0xd0] sm:$0xff] %v931_v4  ;;  %v916_v7 = vadd.f32 %v1466_v5, %v399_v63  ;;  %v932_v8 = vadd.f32 %v1514_v6, %v415_v1  ;;  %v1381_v63 = vclamps-f32 (!%p1379_p12), %v1012_v52, 20.0  ;;  %v1017_v1 = vadd.f32 (!%p1379_p12), %v2004_v50, %v978_v60  ;;  %v981_v3 = vld [vmem:[#allocation2 + $0x40] sm:$0xff] (!%p1379_p12) }
 0x16e   : > { %v1018_v2 = vadd.f32 (!%p1379_p12), %v2004_v50, %v979_v61  ;;  %v982_v4 = vld [vmem:[#allocation2 + $0x48] sm:$0xff] (!%p1379_p12)  ;;  %v1383_v5 = vclamps-f32 (!%p1379_p12), %v1014_v57, 20.0  ;;  %v1384_v6 = vclamps-f32 (!%p1379_p12), %v1015_v58, 20.0  ;;  %v1031_v61 = vadd.f32 (!%p1379_p12), %v2004_v50, %v992_v51 }
 0x16f   : > { %948 = vst [vmem:[#allocation2 + $0x58] sm:$0xff] %v916_v7  ;;  %964 = vst [vmem:[#allocation2 + $0xd8] sm:$0xff] %v932_v8  ;;  %v1467_v9 = vpop.f32.mrb[24].mxu0  ;;  %v1515_v10 = vpop.f32.mrb[24].mxu1  ;;  %v1385_v7 = vclamps-f32 (!%p1379_p12), %v1016_v59, 20.0  ;;  %v1019_v8 = vadd.f32 (!%p1379_p12), %v2004_v50, %v980_v62  ;;  %v993_v62 = vld [vmem:[#allocation2 + $0xa0] sm:$0xff] (!%p1379_p12) }
 0x170   : > { %v1468_v12 = vpop.f32.mrb[25].mxu0  ;;  %v1516_v14 = vpop.f32.mrb[25].mxu1 }
 0x171   : > { %v1469_v15 = vadd.f32 %v1468_v12, %v1467_v9  ;;  %v1517_v16 = vadd.f32 %v1516_v14, %v1515_v10  ;;  %v1470_v17 = vpop.f32.mrb[26].mxu0  ;;  %v1518_v18 = vpop.f32.mrb[26].mxu1  ;;  %v1108_v12 = vmul.f32 (!%p1379_p12), 1.442695, %v1381_v63  ;;  %v1386_v14 = vclamps-f32 (!%p1379_p12), %v1017_v1, 20.0  ;;  %v994_v63 = vld [vmem:[#allocation2 + $0xa8] sm:$0xff] (!%p1379_p12) }
 0x172   : > { %v1471_v20 = vpop.f32.mrb[27].mxu0  ;;  %v1519_v22 = vpop.f32.mrb[27].mxu1 }
 0x173   : > { %v917_v23 = vadd.f32 %v1469_v15, %v400_v11  ;;  %v933_v24 = vadd.f32 %v1517_v16, %v416_v13  ;;  %v1472_v25 = vadd.f32 %v1471_v20, %v1470_v17  ;;  %v1520_v26 = vadd.f32 %v1519_v22, %v1518_v18 }
 0x174   : > { %v983_v9 = vld [vmem:[#allocation2 + $0x50] sm:$0xff] (!%p1379_p12)  ;;  %v1110_v13 = vmul.f32 (!%p1379_p12), 1.442695, %v1382_v0  ;;  %v1387_v15 = vclamps-f32 (!%p1379_p12), %v1018_v2, 20.0  ;;  %v1112_v16 = vmul.f32 (!%p1379_p12), 1.442695, %v1383_v5  ;;  %1665 = vpow2.f32 (!%p1379_p12), %v1108_v12 }
 0x175   : > { %949 = vst [vmem:[#allocation2 + $0x60] sm:$0xff] %v917_v23  ;;  %965 = vst [vmem:[#allocation2 + $0xe0] sm:$0xff] %v933_v24  ;;  %v918_v27 = vadd.f32 %v1472_v25, %v401_v19  ;;  %v934_v28 = vadd.f32 %v1520_v26, %v417_v21  ;;  %v1114_v17 = vmul.f32 (!%p1379_p12), 1.442695, %v1384_v6  ;;  %v1116_v18 = vmul.f32 (!%p1379_p12), 1.442695, %v1385_v7 }
 0x176   : > { %v984_v10 = vld [vmem:[#allocation2 + $0x58] sm:$0xff] (!%p1379_p12)  ;;  %v1020_v19 = vadd.f32 (!%p1379_p12), %v2004_v50, %v981_v3  ;;  %v1118_v20 = vmul.f32 (!%p1379_p12), 1.442695, %v1386_v14  ;;  %v1120_v21 = vmul.f32 (!%p1379_p12), 1.442695, %v1387_v15  ;;  %v1388_v22 = vclamps-f32 (!%p1379_p12), %v1019_v8, 20.0 }
 0x177   : > { %950 = vst [vmem:[#allocation2 + $0x68] sm:$0xff] %v918_v27  ;;  %966 = vst [vmem:[#allocation2 + $0xe8] sm:$0xff] %v934_v28  ;;  %v1473_v29 = vpop.f32.mrb[28].mxu0  ;;  %v1521_v30 = vpop.f32.mrb[28].mxu1  ;;  %1667 = vpow2.f32 (!%p1379_p12), %v1110_v13  ;;  %v1021_v24 = vadd.f32 (!%p1379_p12), %v2004_v50, %v982_v4  ;;  %v1022_v25 = vadd.f32 (!%p1379_p12), %v2004_v50, %v983_v9  ;;  %v1023_v28 = vadd.f32 (!%p1379_p12), %v2004_v50, %v984_v10  ;;  %v995_v4 = vld [vmem:[#allocation2 + $0xb0] sm:$0xff] (!%p1379_p12) }
 0x178   : > { %v1474_v32 = vpop.f32.mrb[29].mxu0  ;;  %v1522_v34 = vpop.f32.mrb[29].mxu1  ;;  %v1389_v23 = vclamps-f32 (!%p1379_p12), %v1020_v19, 20.0  ;;  %1669 = vpow2.f32 (!%p1379_p12), %v1112_v16  ;;  %v1122_v27 = vmul.f32 (!%p1379_p12), 1.442695, %v1388_v22  ;;  %v1032_v12 = vadd.f32 (!%p1379_p12), %v2004_v50, %v993_v62 }
 0x179   : > { %v1475_v35 = vadd.f32 %v1474_v32, %v1473_v29  ;;  %v1523_v36 = vadd.f32 %v1522_v34, %v1521_v30  ;;  %v1476_v37 = vpop.f32.mrb[30].mxu0  ;;  %v1524_v38 = vpop.f32.mrb[30].mxu1  ;;  %972 = sbr.rel (%p1379_p12) target bundleno = 427 (0x1ab), region = 78  ;;  %1671 = vpow2.f32 (!%p1379_p12), %v1114_v17  ;;  %v1390_v32 = vclamps-f32 (!%p1379_p12), %v1021_v24, 20.0  ;;  %v996_v17 = vld [vmem:[#allocation2 + $0xb8] sm:$0xff] (!%p1379_p12) }
 0x17a   : > { %v1477_v40 = vpop.f32.mrb[31].mxu0  ;;  %v1525_v42 = vpop.f32.mrb[31].mxu1  ;;  %1673 = vpow2.f32 (!%p1379_p12), %v1116_v18  ;;  %v1392_v34 = vclamps-f32 (!%p1379_p12), %v1023_v28, 20.0  ;;  %v1033_v15 = vadd.f32 (!%p1379_p12), %v2004_v50, %v994_v63  ;;  %v1034_v16 = vadd.f32 (!%p1379_p12), %v2004_v50, %v995_v4 }
 0x17b   : > { %v919_v43 = vadd.f32 %v1475_v35, %v402_v31  ;;  %v935_v44 = vadd.f32 %v1523_v36, %v418_v33  ;;  %v1478_v45 = vadd.f32 %v1477_v40, %v1476_v37  ;;  %v1526_v46 = vadd.f32 %v1525_v42, %v1524_v38  ;;  %v989_v38 = vld [vmem:[#allocation2 + $0x80] sm:$0xff] (!%p1379_p12)  ;;  %v990_v42 = vld [vmem:[#allocation2 + $0x88] sm:$0xff] (!%p1379_p12) }
 0x17c   : > { %v985_v11 = vld [vmem:[#allocation2 + $0x60] sm:$0xff] (!%p1379_p12)  ;;  %v1124_v31 = vmul.f32 (!%p1379_p12), 1.442695, %v1389_v23  ;;  %v1391_v33 = vclamps-f32 (!%p1379_p12), %v1022_v25, 20.0  ;;  %1675 = vpow2.f32 (!%p1379_p12), %v1118_v20  ;;  %v1028_v49 = vadd.f32 (!%p1379_p12), %v2004_v50, %v989_v38 }
 0x17d   : > { %951 = vst [vmem:[#allocation2 + $0x70] sm:$0xff] %v919_v43  ;;  %967 = vst [vmem:[#allocation2 + $0xf0] sm:$0xff] %v935_v44  ;;  %v920_v47 = vadd.f32 %v1478_v45, %v403_v39  ;;  %v936_v48 = vadd.f32 %v1526_v46, %v419_v41  ;;  %v1024_v29 = vadd.f32 (!%p1379_p12), %v2004_v50, %v985_v11  ;;  %v1126_v39 = vmul.f32 (!%p1379_p12), 1.442695, %v1390_v32  ;;  %v991_v43 = vld [vmem:[#allocation2 + $0x90] sm:$0xff] (!%p1379_p12)  ;;  %v1001_v51 = vld [vmem:[#allocation2 + $0xe0] sm:$0xff] (!%p1379_p12) }
 0x17e   : > { %v986_v26 = vld [vmem:[#allocation2 + $0x68] sm:$0xff] (!%p1379_p12)  ;;  %v1128_v40 = vmul.f32 (!%p1379_p12), 1.442695, %v1391_v33  ;;  %1677 = vpow2.f32 (!%p1379_p12), %v1120_v21  ;;  %v1130_v44 = vmul.f32 (!%p1379_p12), 1.442695, %v1392_v34  ;;  %v1029_v53 = vadd.f32 (!%p1379_p12), %v2004_v50, %v990_v42  ;;  %v1666_v58 = vpop.eup (!%p1379_p12), %1665  ;;  %v999_v32 = vld [vmem:[#allocation2 + $0xd0] sm:$0xff] (!%p1379_p12) }
 0x17f   : > { %952 = vst [vmem:[#allocation2 + $0x78] sm:$0xff] %v920_v47  ;;  %968 = vst [vmem:[#allocation2 + $0xf8] sm:$0xff] %v936_v48  ;;  %v1393_v35 = vclamps-f32 (!%p1379_p12), %v1024_v29, 20.0  ;;  %v1025_v36 = vadd.f32 (!%p1379_p12), %v2004_v50, %v986_v26  ;;  %1679 = vpow2.f32 (!%p1379_p12), %v1122_v27  ;;  %v1030_v54 = vadd.f32 (!%p1379_p12), %v2004_v50, %v991_v43  ;;  %v997_v26 = vld [vmem:[#allocation2 + $0xc0] sm:$0xff] (!%p1379_p12) }
 0x180   : > { %1681 = vpow2.f32 %v1124_v31  ;;  %v1397_v57 = vclamps-f32 %v1028_v49, 20.0  ;;  %v1398_v59 = vclamps-f32 %v1029_v53, 20.0  ;;  %v1172_v1 = vadd.f32 1.0, %v1666_v58  ;;  %v998_v31 = vld [vmem:[#allocation2 + $0xc8] sm:$0xff] }
 0x181   : > { %v1132_v45 = vmul.f32 1.442695, %v1393_v35  ;;  %v1394_v46 = vclamps-f32 %v1025_v36, 20.0  ;;  %1683 = vpow2.f32 %v1126_v39  ;;  %v1399_v60 = vclamps-f32 %v1030_v54, 20.0  ;;  %v1668_v0 = vpop.eup %1667 }
 0x182   : > { %1685 = vpow2.f32 %v1128_v40  ;;  %v1140_v3 = vmul.f32 1.442695, %v1397_v57  ;;  %v1670_v5 = vpop.eup %1669  ;;  %v1173_v6 = vadd.f32 1.0, %v1668_v0  ;;  %v1142_v7 = vmul.f32 1.442695, %v1398_v59  ;;  %1204 = vst [vmem:[%s1941_s24] sm:$0xff] %v1172_v1 }
 0x183   : > { %v1134_v52 = vmul.f32 1.442695, %v1394_v46  ;;  %1687 = vpow2.f32 %v1130_v44  ;;  %v1144_v8 = vmul.f32 1.442695, %v1399_v60  ;;  %v1672_v9 = vpop.eup %1671  ;;  %v1174_v10 = vadd.f32 1.0, %v1670_v5 }
 0x184   : > { %v987_v30 = vld [vmem:[#allocation2 + $0x70] sm:$0xff]  ;;  %1689 = vpow2.f32 %v1132_v45  ;;  %v1400_v11 = vclamps-f32 %v1031_v61, 20.0  ;;  %v1674_v13 = vpop.eup %1673  ;;  %1205 = vst [vmem:[%s1941_s24 + $0x8] sm:$0xff] %v1173_v6  ;;  %v1175_v14 = vadd.f32 1.0, %v1672_v9  ;;  %v1401_v21 = vclamps-f32 %v1032_v12, 20.0  ;;  %v1000_v45 = vld [vmem:[#allocation2 + $0xd8] sm:$0xff] }
 0x185   : > { %v1026_v41 = vadd.f32 %v2004_v50, %v987_v30  ;;  %1691 = vpow2.f32 %v1134_v52  ;;  %1206 = vst [vmem:[%s1941_s24 + $0x10] sm:$0xff] %v1174_v10  ;;  %v1176_v19 = vadd.f32 1.0, %v1674_v13  ;;  %v1402_v24 = vclamps-f32 %v1033_v15, 20.0  ;;  %v1003_v61 = vld [vmem:[#allocation2 + $0xf0] sm:$0xff] }
 0x186   : > { %v988_v37 = vld [vmem:[#allocation2 + $0x78] sm:$0xff]  ;;  %v1676_v18 = vpop.eup %1675  ;;  %v1146_v20 = vmul.f32 1.442695, %v1400_v11  ;;  %1207 = vst [vmem:[%s1941_s24 + $0x18] sm:$0xff] %v1175_v14  ;;  %v1403_v25 = vclamps-f32 %v1034_v16, 20.0  ;;  %v1035_v30 = vadd.f32 %v2004_v50, %v996_v17  ;;  %v1036_v40 = vadd.f32 %v2004_v50, %v997_v26 }
 0x187   : > { %v1395_v47 = vclamps-f32 %v1026_v41, 20.0  ;;  %v1027_v48 = vadd.f32 %v2004_v50, %v988_v37  ;;  %v1177_v23 = vadd.f32 1.0, %v1676_v18  ;;  %1208 = vst [vmem:[%s1941_s24 + $0x20] sm:$0xff] %v1176_v19  ;;  %v1148_v29 = vmul.f32 1.442695, %v1401_v21 }
 0x188   : > { %v1678_v22 = vpop.eup %1677  ;;  %v1150_v35 = vmul.f32 1.442695, %v1402_v24  ;;  %v1152_v36 = vmul.f32 1.442695, %v1403_v25  ;;  %v1404_v39 = vclamps-f32 %v1035_v30, 20.0  ;;  %v1037_v43 = vadd.f32 %v2004_v50, %v998_v31 }
 0x189   : > { %v1136_v55 = vmul.f32 1.442695, %v1395_v47  ;;  %v1396_v56 = vclamps-f32 %v1027_v48, 20.0  ;;  %v1680_v27 = vpop.eup %1679  ;;  %v1178_v28 = vadd.f32 1.0, %v1678_v22  ;;  %1209 = vst [vmem:[%s1941_s24 + $0x28] sm:$0xff] %v1177_v23  ;;  %v1038_v44 = vadd.f32 %v2004_v50, %v999_v32 }
 0x18a   : > { %v1682_v33 = vpop.eup %1681  ;;  %v1179_v34 = vadd.f32 1.0, %v1680_v27  ;;  %v1154_v48 = vmul.f32 1.442695, %v1404_v39  ;;  %v1405_v49 = vclamps-f32 %v1036_v40, 20.0  ;;  %v1406_v54 = vclamps-f32 %v1037_v43, 20.0 }
 0x18b   : > { %v1138_v2 = vmul.f32 1.442695, %v1396_v56  ;;  %1693 = vpow2.f32 %v1136_v55  ;;  %v1684_v37 = vpop.eup %1683  ;;  %1210 = vst [vmem:[%s1941_s24 + $0x30] sm:$0xff] %v1178_v28  ;;  %v1180_v38 = vadd.f32 1.0, %v1682_v33  ;;  %v1407_v55 = vclamps-f32 %v1038_v44, 20.0  ;;  %v1002_v56 = vld [vmem:[#allocation2 + $0xe8] sm:$0xff] }
 0x18c   : > { %v1686_v41 = vpop.eup %1685  ;;  %1211 = vst [vmem:[%s1941_s24 + $0x38] sm:$0xff] %v1179_v34  ;;  %v1181_v42 = vadd.f32 1.0, %v1684_v37  ;;  %v1156_v59 = vmul.f32 1.442695, %v1405_v49  ;;  %v1039_v60 = vadd.f32 %v2004_v50, %v1000_v45  ;;  %v1158_v0 = vmul.f32 1.442695, %v1406_v54 }
 0x18d   : > { %1695 = vpow2.f32 %v1138_v2  ;;  %v1688_v46 = vpop.eup %1687  ;;  %1212 = vst [vmem:[%s1941_s24 + $0x40] sm:$0xff] %v1180_v38  ;;  %v1182_v47 = vadd.f32 1.0, %v1686_v41  ;;  %v1160_v1 = vmul.f32 1.442695, %v1407_v55  ;;  %v1040_v2 = vadd.f32 %v2004_v50, %v1001_v51 }
 0x18e   : > { %1697 = vpow2.f32 %v1140_v3  ;;  %v1690_v52 = vpop.eup %1689  ;;  %1213 = vst [vmem:[%s1941_s24 + $0x48] sm:$0xff] %v1181_v42  ;;  %v1183_v53 = vadd.f32 1.0, %v1688_v46  ;;  %v1408_v5 = vclamps-f32 %v1039_v60, 20.0  ;;  %v1041_v6 = vadd.f32 %v2004_v50, %v1002_v56 }
 0x18f   : > { %1699 = vpow2.f32 %v1142_v7  ;;  %v1692_v57 = vpop.eup %1691  ;;  %1214 = vst [vmem:[%s1941_s24 + $0x50] sm:$0xff] %v1182_v47  ;;  %v1184_v58 = vadd.f32 1.0, %v1690_v52  ;;  %v1004_v7 = vld [vmem:[#allocation2 + $0xf8] sm:$0xff]  ;;  %v1409_v10 = vclamps-f32 %v1040_v2, 20.0  ;;  %v1042_v11 = vadd.f32 %v2004_v50, %v1003_v61 }
 0x190   : > { %1701 = vpow2.f32 %v1144_v8  ;;  %1215 = vst [vmem:[%s1941_s24 + $0x58] sm:$0xff] %v1183_v53  ;;  %v1185_v63 = vadd.f32 1.0, %v1692_v57  ;;  %v1162_v14 = vmul.f32 1.442695, %v1408_v5  ;;  %v1410_v15 = vclamps-f32 %v1041_v6, 20.0 }
 0x191   : > { %1703 = vpow2.f32 %v1146_v20  ;;  %1216 = vst [vmem:[%s1941_s24 + $0x60] sm:$0xff] %v1184_v58  ;;  %v1164_v18 = vmul.f32 1.442695, %v1409_v10  ;;  %v1411_v19 = vclamps-f32 %v1042_v11, 20.0  ;;  %v1043_v20 = vadd.f32 %v2004_v50, %v1004_v7 }
 0x192   : > { %1705 = vpow2.f32 %v1148_v29  ;;  %1217 = vst [vmem:[%s1941_s24 + $0x68] sm:$0xff] %v1185_v63  ;;  %v1166_v23 = vmul.f32 1.442695, %v1410_v15 }
 0x193   : > { %1707 = vpow2.f32 %v1150_v35  ;;  %v1168_v26 = vmul.f32 1.442695, %v1411_v19  ;;  %v1412_v27 = vclamps-f32 %v1043_v20, 20.0 }
 0x194   : > { %1709 = vpow2.f32 %v1152_v36 }
 0x195   : > { %1711 = vpow2.f32 %v1154_v48  ;;  %v1694_v62 = vpop.eup %1693  ;;  %v1170_v31 = vmul.f32 1.442695, %v1412_v27 }
 0x196   : > { %v1186_v4 = vadd.f32 1.0, %v1694_v62  ;;  %1713 = vpow2.f32 %v1156_v59 }
 0x197   : > { %v1696_v3 = vpop.eup %1695  ;;  %1715 = vpow2.f32 %v1158_v0 }
 0x198   : > { %v1698_v8 = vpop.eup %1697  ;;  %v1187_v9 = vadd.f32 1.0, %v1696_v3  ;;  %1218 = vst [vmem:[%s1941_s24 + $0x70] sm:$0xff] %v1186_v4  ;;  %1717 = vpow2.f32 %v1160_v1 }
 0x199   : > { %v1700_v12 = vpop.eup %1699  ;;  %v1188_v13 = vadd.f32 1.0, %v1698_v8  ;;  %1719 = vpow2.f32 %v1162_v14 }
 0x19a   : > { %v1702_v16 = vpop.eup %1701  ;;  %1219 = vst [vmem:[%s1941_s24 + $0x78] sm:$0xff] %v1187_v9  ;;  %v1189_v17 = vadd.f32 1.0, %v1700_v12  ;;  %1721 = vpow2.f32 %v1164_v18 }
 0x19b   : > { %v1704_v21 = vpop.eup %1703  ;;  %1220 = vst [vmem:[%s1941_s24 + $0x80] sm:$0xff] %v1188_v13  ;;  %v1190_v22 = vadd.f32 1.0, %v1702_v16  ;;  %1723 = vpow2.f32 %v1166_v23 }
 0x19c   : > { %v1706_v24 = vpop.eup %1705  ;;  %1221 = vst [vmem:[%s1941_s24 + $0x88] sm:$0xff] %v1189_v17  ;;  %v1191_v25 = vadd.f32 1.0, %v1704_v21  ;;  %1725 = vpow2.f32 %v1168_v26 }
 0x19d   : > { %v1708_v28 = vpop.eup %1707  ;;  %1222 = vst [vmem:[%s1941_s24 + $0x90] sm:$0xff] %v1190_v22  ;;  %v1192_v29 = vadd.f32 1.0, %v1706_v24  ;;  %1727 = vpow2.f32 %v1170_v31 }
 0x19e   : > { %v1710_v50 = vpop.eup %1709  ;;  %1223 = vst [vmem:[%s1941_s24 + $0x98] sm:$0xff] %v1191_v25  ;;  %v1193_v30 = vadd.f32 1.0, %v1708_v28 }
 0x19f   : > { %v1712_v32 = vpop.eup %1711  ;;  %1224 = vst [vmem:[%s1941_s24 + $0xa0] sm:$0xff] %v1192_v29  ;;  %v1194_v33 = vadd.f32 1.0, %v1710_v50 }
 0x1a0   : > { %1225 = vst [vmem:[%s1941_s24 + $0xa8] sm:$0xff] %v1193_v30  ;;  %v1195_v34 = vadd.f32 1.0, %v1712_v32  ;;  %v1714_v35 = vpop.eup %1713 }
 0x1a1   : > { %1226 = vst [vmem:[%s1941_s24 + $0xb0] sm:$0xff] %v1194_v33  ;;  %v1716_v36 = vpop.eup %1715  ;;  %v1196_v37 = vadd.f32 1.0, %v1714_v35 }
 0x1a2   : > { %1227 = vst [vmem:[%s1941_s24 + $0xb8] sm:$0xff] %v1195_v34  ;;  %v1718_v38 = vpop.eup %1717  ;;  %v1197_v39 = vadd.f32 1.0, %v1716_v36 }
 0x1a3   : > { %1228 = vst [vmem:[%s1941_s24 + $0xc0] sm:$0xff] %v1196_v37  ;;  %v1198_v40 = vadd.f32 1.0, %v1718_v38  ;;  %v1720_v41 = vpop.eup %1719 }
 0x1a4   : > { %1229 = vst [vmem:[%s1941_s24 + $0xc8] sm:$0xff] %v1197_v39  ;;  %v1722_v42 = vpop.eup %1721  ;;  %v1199_v43 = vadd.f32 1.0, %v1720_v41 }
 0x1a5   : > { %1230 = vst [vmem:[%s1941_s24 + $0xd0] sm:$0xff] %v1198_v40  ;;  %v1724_v44 = vpop.eup %1723  ;;  %v1200_v45 = vadd.f32 1.0, %v1722_v42 }
 0x1a6   : > { %v1726_v46 = vpop.eup %1725  ;;  %1231 = vst [vmem:[%s1941_s24 + $0xd8] sm:$0xff] %v1199_v43  ;;  %v1201_v47 = vadd.f32 1.0, %v1724_v44 }
 0x1a7   : > { %1232 = vst [vmem:[%s1941_s24 + $0xe0] sm:$0xff] %v1200_v45  ;;  %v1202_v48 = vadd.f32 1.0, %v1726_v46  ;;  %v1728_v49 = vpop.eup %1727 }
 0x1a8   : > { %1233 = vst [vmem:[%s1941_s24 + $0xe8] sm:$0xff] %v1201_v47  ;;  %v1203_v51 = vadd.f32 1.0, %v1728_v49 }
 0x1a9   : > { %1234 = vst [vmem:[%s1941_s24 + $0xf0] sm:$0xff] %v1202_v48 }
 0x1aa   : > { %1235 = vst [vmem:[%s1941_s24 + $0xf8] sm:$0xff] %v1203_v51 }
 0x1ab PF: > { %s13_s18 = sadd.s32 1, %s1783_s18   ;;  %s2095_s12 = smov %s1763_s13 }
 0x1ac   : > { %p10_p13 = scmp.ge.s32.totalorder %s13_s18, 11   ;;  %s2096_s13 = smov %s1857_s25 }
 0x1ad   : > { %s2097_s14 = smov %s1775_s16  ;;  %s2098_s15 = smov %s1779_s17 }
 0x1ae   : > { %s2099_s16 = smov %s2102_s19  ;;  %s2100_s17 = smov %s2106_s20 }
 0x1af   :  { %12 = sbr.rel (!%p10_p13) target bundleno = 4 (0x4), region = 114 }

</bundles_post_ra>
